<compile_context>
chip_gen: v6e
topology: v6e:2x2x1
jax: 0.10.0
libtpu: 0.0.40
codegen_flags: <defaults>
</compile_context>

<pallas_src>
import jax
import jax.numpy as jnp
from jax import lax
from jax.experimental import pallas as pl
from jax.experimental.pallas import tpu as pltpu


def _round_up(n, m):
    return ((n + m - 1) // m) * m


def _cdiv(a, b):
    return (a + b - 1) // b


def _default_io_dtype():
    # bf16 I/O halves HBM traffic and VMEM tiles on v6e/v7x; keep f32 on v5e and
    # older parts (no native bf16 VPU path -> widening would hit the binding VALU).
    try:
        kind = jax.devices()[0].device_kind.lower()
    except Exception:
        return jnp.float32
    if ("v6" in kind) or ("v7" in kind):
        return jnp.bfloat16
    return jnp.float32


def _make_kernel(cb, h_dim):
    def kernel(x_ref, w_ref, b_ref, o_ref):
        # x_ref: (block_b, lp) VMEM tile, length on lanes.
        # w_ref: (3*H,) f32 SMEM, tap-major: [w[:,0,0] | w[:,0,1] | w[:,0,2]].
        # b_ref: (H,)   f32 SMEM.
        bt, lp = x_ref.shape
        n_chunks = bt // cb

        def chunk_body(c, carry):
            r0 = pl.multiple_of(c * cb, cb)
            xc = x_ref[pl.ds(r0, cb), :].astype(jnp.float32)

            # Conv taps with 'same' zero padding.  lp >= L+1 guarantees a zero
            # right-pad column, so roll(+1) wraps the correct zero into lane 0
            # and roll(lp-1)'s wrap only touches padded output lanes (sliced off).
            xm1 = pltpu.roll(xc, shift=1, axis=1)        # xm1[l] = x[l-1]
            xp1 = pltpu.roll(xc, shift=lp - 1, axis=1)   # xp1[l] = x[l+1]

            # h = 0 term initializes the running max (no -inf splat).
            acc = w_ref[0] * xm1 + w_ref[h_dim] * xc + w_ref[2 * h_dim] * xp1 + b_ref[0]

            # Fully-unrolled H loop with static SMEM weight offsets; all operands
            # stay in vregs for the whole loop (register blocking).
            for h in range(1, h_dim):
                z = (w_ref[h] * xm1
                     + w_ref[h_dim + h] * xc
                     + w_ref[2 * h_dim + h] * xp1
                     + b_ref[h])
                acc = jnp.maximum(acc, z)

            # ReLU commutes with max over h; Dropout(p=0) is identity.
            o_ref[pl.ds(r0, cb), :] = jnp.maximum(acc, 0.0).astype(o_ref.dtype)
            return carry

        lax.fori_loop(0, n_chunks, chunk_body, 0)

    return kernel


def cnn1d_encoder(x, conv_w, conv_b, *, io_dtype=None, block_b=None):
    """x: (B, L); conv_w: (H, 1, 3) (PyTorch Conv1d layout); conv_b: (H,)."""
    B, L = x.shape
    H = conv_w.shape[0]
    assert conv_w.shape == (H, 1, 3), "implements in_dim == 1, kernel_size == 3"
    assert conv_b.shape == (H,)

    if io_dtype is None:
        io_dtype = _default_io_dtype()
    io_dtype = jax.dtypes.canonicalize_dtype(io_dtype)
    itemsize = io_dtype.itemsize
    row_align = 8 if itemsize == 4 else 16   # sublane packing for f32 / bf16

    # Lane-dense layout with >= 1 zero column of right padding (drops all edge masks).
    lp = _round_up(L + 1, 128)
    rb = _round_up(B, row_align)

    # Rows per in-kernel vreg chunk: keep each operand at <= ~4 vregs so the
    # fully-unrolled H loop runs entirely out of vregs.
    if lp > 512:
        cb = row_align
    else:
        cb = max(row_align, min(64, (4096 // lp) // row_align * row_align))
    cb = min(cb, rb)
    if rb >= 2 * row_align:
        # Keep cb small enough that the batch grid can still split into >= 2 steps.
        cb = min(cb, max(row_align, (rb // 2) // row_align * row_align))

    # Batch tile: ~2 MiB of input per grid step (double-buffered in+out stays well
    # under the 32 MiB scoped-VMEM budget on every generation, incl. v7x).
    if block_b is None:
        tgt = max(cb, min(4096, (2 * 1024 * 1024) // (lp * itemsize)))
        block_b = (tgt // cb) * cb
    block_b = max(cb, (block_b // cb) * cb)
    # >= 2 grid steps whenever possible: keeps both v7x TensorCores busy and gives
    # the BlockSpec pipeline something to overlap.
    if rb >= 2 * cb:
        block_b = min(block_b, _cdiv(_cdiv(rb, 2), cb) * cb)
    block_b = min(block_b, _round_up(rb, cb))
    bp = _round_up(rb, block_b)

    # TODO(synk): the zero-pad is a separate XLA HBM pass (~input-sized extra
    # traffic); fusing it into the kernel's input DMA (allow_input_fusion) or
    # masking ragged edges in-kernel would remove it.
    # TODO(synk): for very long L (lp >> 4K) add an L grid axis with a 1-column
    # halo instead of keeping all of L in one block.
    x_pad = jnp.zeros((bp, lp), io_dtype).at[:B, :L].set(x.astype(io_dtype))

    w_flat = jnp.transpose(conv_w[:, 0, :], (1, 0)).reshape(-1).astype(jnp.float32)  # (3H,)
    b_flat = conv_b.reshape(-1).astype(jnp.float32)                                  # (H,)

    grid = (bp // block_b,)
    out = pl.pallas_call(
        _make_kernel(cb, H),
        out_shape=jax.ShapeDtypeStruct((bp, lp), io_dtype),
        grid_spec=pltpu.PrefetchScalarGridSpec(
            num_scalar_prefetch=0,
            grid=grid,
            in_specs=[
                pl.BlockSpec((block_b, lp), lambda i: (i, 0)),
                pl.BlockSpec(memory_space=pltpu.MemorySpace.SMEM),
                pl.BlockSpec(memory_space=pltpu.MemorySpace.SMEM),
            ],
            out_specs=pl.BlockSpec((block_b, lp), lambda i: (i, 0)),
        ),
        compiler_params=pltpu.CompilerParams(
            dimension_semantics=("parallel",),
            vmem_limit_bytes=32 * 1024 * 1024,
        ),
        cost_estimate=pl.CostEstimate(
            flops=7 * bp * lp * H,
            transcendentals=0,
            bytes_accessed=2 * bp * lp * itemsize + 4 * (4 * H),
        ),
    )(x_pad, w_flat, b_flat)
    return out[:B, :L]


def cnn1d_encoder_reference(x, conv_w, conv_b):
    """Plain-JAX reference matching the PyTorch forward (in_dim == 1)."""
    B, L = x.shape
    w_t = jnp.transpose(conv_w[:, 0, :], (1, 0))                    # (3, H)
    xp = jnp.pad(x, ((0, 0), (1, 1)))
    taps = jnp.stack([xp[:, k:k + L] for k in range(3)], axis=-1)   # (B, L, 3)
    y = jnp.einsum("blk,kh->blh", taps, w_t) + conv_b[None, None, :]
    y = jnp.maximum(y, 0.0)
    return jnp.max(y, axis=-1)


if __name__ == "__main__":
    # in_dim=1 (required by the module as written), hidden_dim=32, kernel_size=3.
    B, L, H, K = 4, 16, 32, 3

    key = jax.random.PRNGKey(0)
    kx, kw, kb = jax.random.split(key, 3)
    x = jax.random.normal(kx, (B, L), dtype=jnp.float32)

    # Deterministic Conv1d-style init: U(-sqrt(k), sqrt(k)), k = 1/(in_ch*K) = 1/3.
    bound = (1.0 / (1 * K)) ** 0.5
    conv_w = jax.random.uniform(kw, (H, 1, K), jnp.float32, -bound, bound)
    conv_b = jax.random.uniform(kb, (H,), jnp.float32, -bound, bound)

    # 1) Exact f32 path at the module's small demo shape.
    out = jax.block_until_ready(cnn1d_encoder(x, conv_w, conv_b, io_dtype=jnp.float32))
    ref = cnn1d_encoder_reference(x, conv_w, conv_b)
    assert out.shape == (B, L)
    assert jnp.allclose(out, ref, atol=1e-5, rtol=1e-5), "mismatch vs reference (f32)"

    # 2) Ragged shapes: exercises L/B padding, the >=2-step batch grid (pipelined
    #    DMAs, both v7x TensorCores) and the in-kernel register-blocked chunk loop.
    B2, L2 = 10, 100
    x2 = jax.random.normal(jax.random.PRNGKey(1), (B2, L2), dtype=jnp.float32)
    out2 = jax.block_until_ready(cnn1d_encoder(x2, conv_w, conv_b, io_dtype=jnp.float32))
    ref2 = cnn1d_encoder_reference(x2, conv_w, conv_b)
    assert out2.shape == (B2, L2)
    assert jnp.allclose(out2, ref2, atol=1e-5, rtol=1e-5), "mismatch vs reference (padded)"

    # 3) Default (generation-dependent) I/O dtype: bf16 on v6e/v7x, f32 on v5e.
    #    Compare against the reference run on the dtype-rounded input; loose
    #    tolerance covers bf16 output rounding.
    B3, L3 = 64, 200
    x3 = jax.random.normal(jax.random.PRNGKey(2), (B3, L3), dtype=jnp.float32)
    out3 = jax.block_until_ready(cnn1d_encoder(x3, conv_w, conv_b))
    x3_q = x3.astype(out3.dtype).astype(jnp.float32)
    ref3 = cnn1d_encoder_reference(x3_q, conv_w, conv_b)
    assert out3.shape == (B3, L3)
    assert jnp.allclose(out3.astype(jnp.float32), ref3, atol=2e-2, rtol=2e-2), \
        "mismatch vs reference (default io dtype)"

    # TODO(synk): Dropout with p > 0 (training mode) would need pltpu.prng_*; p=0 here.
    print("KERNEL_OK")
</pallas_src>

<mosaic_0001>
module attributes {stable_mosaic.version = 11 : i64} {
  func.func @kernel(%arg0: i32, %arg1: memref<8x128xf32, #tpu.memory_space<vmem>>, %arg2: memref<96xf32, #tpu.memory_space<smem>>, %arg3: memref<32xf32, #tpu.memory_space<smem>>, %arg4: memref<8x128xf32, #tpu.memory_space<vmem>>) attributes {dimension_semantics = [#tpu.dimension_semantics<parallel>], iteration_bounds = array<i64: 1>, scalar_prefetch = 0 : i64, scratch_operands = 0 : i64, tpu.core_type = #tpu.core_type<tc>, window_params = [{transform_indices = @transform_0, window_bounds = array<i64: 8, 128>}, {transform_indices = @transform_1, window_bounds = array<i64: 96>}, {transform_indices = @transform_2, window_bounds = array<i64: 32>}, {transform_indices = @transform_3, window_bounds = array<i64: 8, 128>}]} {
    %c0_i32 = arith.constant 0 : i32
    %c8_i32 = arith.constant 8 : i32
    %0 = arith.muli %c0_i32, %c8_i32 : i32
    %1 = tpu.assume_multiple %0, 8 : i32
    %2 = arith.index_cast %1 : i32 to index
    %c0 = arith.constant 0 : index
    %3 = vector.load %arg1[%2, %c0] : memref<8x128xf32, #tpu.memory_space<vmem>>, vector<8x128xf32>
    %c1_i32 = arith.constant 1 : i32
    %4 = tpu.dynamic_rotate %3 by %c1_i32 dim 1 : vector<8x128xf32>, i32 -> vector<8x128xf32>
    %c127_i32 = arith.constant 127 : i32
    %5 = tpu.dynamic_rotate %3 by %c127_i32 dim 1 : vector<8x128xf32>, i32 -> vector<8x128xf32>
    %c0_0 = arith.constant 0 : index
    %6 = memref.load %arg2[%c0_0] : memref<96xf32, #tpu.memory_space<smem>>
    %7 = vector.broadcast %6 : f32 to vector<8x128xf32>
    %8 = arith.mulf %7, %4 : vector<8x128xf32>
    %c32 = arith.constant 32 : index
    %9 = memref.load %arg2[%c32] : memref<96xf32, #tpu.memory_space<smem>>
    %10 = vector.broadcast %9 : f32 to vector<8x128xf32>
    %11 = arith.mulf %10, %3 : vector<8x128xf32>
    %12 = arith.addf %8, %11 : vector<8x128xf32>
    %c64 = arith.constant 64 : index
    %13 = memref.load %arg2[%c64] : memref<96xf32, #tpu.memory_space<smem>>
    %14 = vector.broadcast %13 : f32 to vector<8x128xf32>
    %15 = arith.mulf %14, %5 : vector<8x128xf32>
    %16 = arith.addf %12, %15 : vector<8x128xf32>
    %c0_1 = arith.constant 0 : index
    %17 = memref.load %arg3[%c0_1] : memref<32xf32, #tpu.memory_space<smem>>
    %18 = vector.broadcast %17 : f32 to vector<8x128xf32>
    %19 = arith.addf %16, %18 : vector<8x128xf32>
    %c1 = arith.constant 1 : index
    %20 = memref.load %arg2[%c1] : memref<96xf32, #tpu.memory_space<smem>>
    %21 = vector.broadcast %20 : f32 to vector<8x128xf32>
    %22 = arith.mulf %21, %4 : vector<8x128xf32>
    %c33 = arith.constant 33 : index
    %23 = memref.load %arg2[%c33] : memref<96xf32, #tpu.memory_space<smem>>
    %24 = vector.broadcast %23 : f32 to vector<8x128xf32>
    %25 = arith.mulf %24, %3 : vector<8x128xf32>
    %26 = arith.addf %22, %25 : vector<8x128xf32>
    %c65 = arith.constant 65 : index
    %27 = memref.load %arg2[%c65] : memref<96xf32, #tpu.memory_space<smem>>
    %28 = vector.broadcast %27 : f32 to vector<8x128xf32>
    %29 = arith.mulf %28, %5 : vector<8x128xf32>
    %30 = arith.addf %26, %29 : vector<8x128xf32>
    %c1_2 = arith.constant 1 : index
    %31 = memref.load %arg3[%c1_2] : memref<32xf32, #tpu.memory_space<smem>>
    %32 = vector.broadcast %31 : f32 to vector<8x128xf32>
    %33 = arith.addf %30, %32 : vector<8x128xf32>
    %34 = arith.maximumf %19, %33 : vector<8x128xf32>
    %c2 = arith.constant 2 : index
    %35 = memref.load %arg2[%c2] : memref<96xf32, #tpu.memory_space<smem>>
    %36 = vector.broadcast %35 : f32 to vector<8x128xf32>
    %37 = arith.mulf %36, %4 : vector<8x128xf32>
    %c34 = arith.constant 34 : index
    %38 = memref.load %arg2[%c34] : memref<96xf32, #tpu.memory_space<smem>>
    %39 = vector.broadcast %38 : f32 to vector<8x128xf32>
    %40 = arith.mulf %39, %3 : vector<8x128xf32>
    %41 = arith.addf %37, %40 : vector<8x128xf32>
    %c66 = arith.constant 66 : index
    %42 = memref.load %arg2[%c66] : memref<96xf32, #tpu.memory_space<smem>>
    %43 = vector.broadcast %42 : f32 to vector<8x128xf32>
    %44 = arith.mulf %43, %5 : vector<8x128xf32>
    %45 = arith.addf %41, %44 : vector<8x128xf32>
    %c2_3 = arith.constant 2 : index
    %46 = memref.load %arg3[%c2_3] : memref<32xf32, #tpu.memory_space<smem>>
    %47 = vector.broadcast %46 : f32 to vector<8x128xf32>
    %48 = arith.addf %45, %47 : vector<8x128xf32>
    %49 = arith.maximumf %34, %48 : vector<8x128xf32>
    %c3 = arith.constant 3 : index
    %50 = memref.load %arg2[%c3] : memref<96xf32, #tpu.memory_space<smem>>
    %51 = vector.broadcast %50 : f32 to vector<8x128xf32>
    %52 = arith.mulf %51, %4 : vector<8x128xf32>
    %c35 = arith.constant 35 : index
    %53 = memref.load %arg2[%c35] : memref<96xf32, #tpu.memory_space<smem>>
    %54 = vector.broadcast %53 : f32 to vector<8x128xf32>
    %55 = arith.mulf %54, %3 : vector<8x128xf32>
    %56 = arith.addf %52, %55 : vector<8x128xf32>
    %c67 = arith.constant 67 : index
    %57 = memref.load %arg2[%c67] : memref<96xf32, #tpu.memory_space<smem>>
    %58 = vector.broadcast %57 : f32 to vector<8x128xf32>
    %59 = arith.mulf %58, %5 : vector<8x128xf32>
    %60 = arith.addf %56, %59 : vector<8x128xf32>
    %c3_4 = arith.constant 3 : index
    %61 = memref.load %arg3[%c3_4] : memref<32xf32, #tpu.memory_space<smem>>
    %62 = vector.broadcast %61 : f32 to vector<8x128xf32>
    %63 = arith.addf %60, %62 : vector<8x128xf32>
    %64 = arith.maximumf %49, %63 : vector<8x128xf32>
    %c4 = arith.constant 4 : index
    %65 = memref.load %arg2[%c4] : memref<96xf32, #tpu.memory_space<smem>>
    %66 = vector.broadcast %65 : f32 to vector<8x128xf32>
    %67 = arith.mulf %66, %4 : vector<8x128xf32>
    %c36 = arith.constant 36 : index
    %68 = memref.load %arg2[%c36] : memref<96xf32, #tpu.memory_space<smem>>
    %69 = vector.broadcast %68 : f32 to vector<8x128xf32>
    %70 = arith.mulf %69, %3 : vector<8x128xf32>
    %71 = arith.addf %67, %70 : vector<8x128xf32>
    %c68 = arith.constant 68 : index
    %72 = memref.load %arg2[%c68] : memref<96xf32, #tpu.memory_space<smem>>
    %73 = vector.broadcast %72 : f32 to vector<8x128xf32>
    %74 = arith.mulf %73, %5 : vector<8x128xf32>
    %75 = arith.addf %71, %74 : vector<8x128xf32>
    %c4_5 = arith.constant 4 : index
    %76 = memref.load %arg3[%c4_5] : memref<32xf32, #tpu.memory_space<smem>>
    %77 = vector.broadcast %76 : f32 to vector<8x128xf32>
    %78 = arith.addf %75, %77 : vector<8x128xf32>
    %79 = arith.maximumf %64, %78 : vector<8x128xf32>
    %c5 = arith.constant 5 : index
    %80 = memref.load %arg2[%c5] : memref<96xf32, #tpu.memory_space<smem>>
    %81 = vector.broadcast %80 : f32 to vector<8x128xf32>
    %82 = arith.mulf %81, %4 : vector<8x128xf32>
    %c37 = arith.constant 37 : index
    %83 = memref.load %arg2[%c37] : memref<96xf32, #tpu.memory_space<smem>>
    %84 = vector.broadcast %83 : f32 to vector<8x128xf32>
    %85 = arith.mulf %84, %3 : vector<8x128xf32>
    %86 = arith.addf %82, %85 : vector<8x128xf32>
    %c69 = arith.constant 69 : index
    %87 = memref.load %arg2[%c69] : memref<96xf32, #tpu.memory_space<smem>>
    %88 = vector.broadcast %87 : f32 to vector<8x128xf32>
    %89 = arith.mulf %88, %5 : vector<8x128xf32>
    %90 = arith.addf %86, %89 : vector<8x128xf32>
    %c5_6 = arith.constant 5 : index
    %91 = memref.load %arg3[%c5_6] : memref<32xf32, #tpu.memory_space<smem>>
    %92 = vector.broadcast %91 : f32 to vector<8x128xf32>
    %93 = arith.addf %90, %92 : vector<8x128xf32>
    %94 = arith.maximumf %79, %93 : vector<8x128xf32>
    %c6 = arith.constant 6 : index
    %95 = memref.load %arg2[%c6] : memref<96xf32, #tpu.memory_space<smem>>
    %96 = vector.broadcast %95 : f32 to vector<8x128xf32>
    %97 = arith.mulf %96, %4 : vector<8x128xf32>
    %c38 = arith.constant 38 : index
    %98 = memref.load %arg2[%c38] : memref<96xf32, #tpu.memory_space<smem>>
    %99 = vector.broadcast %98 : f32 to vector<8x128xf32>
    %100 = arith.mulf %99, %3 : vector<8x128xf32>
    %101 = arith.addf %97, %100 : vector<8x128xf32>
    %c70 = arith.constant 70 : index
    %102 = memref.load %arg2[%c70] : memref<96xf32, #tpu.memory_space<smem>>
    %103 = vector.broadcast %102 : f32 to vector<8x128xf32>
    %104 = arith.mulf %103, %5 : vector<8x128xf32>
    %105 = arith.addf %101, %104 : vector<8x128xf32>
    %c6_7 = arith.constant 6 : index
    %106 = memref.load %arg3[%c6_7] : memref<32xf32, #tpu.memory_space<smem>>
    %107 = vector.broadcast %106 : f32 to vector<8x128xf32>
    %108 = arith.addf %105, %107 : vector<8x128xf32>
    %109 = arith.maximumf %94, %108 : vector<8x128xf32>
    %c7 = arith.constant 7 : index
    %110 = memref.load %arg2[%c7] : memref<96xf32, #tpu.memory_space<smem>>
    %111 = vector.broadcast %110 : f32 to vector<8x128xf32>
    %112 = arith.mulf %111, %4 : vector<8x128xf32>
    %c39 = arith.constant 39 : index
    %113 = memref.load %arg2[%c39] : memref<96xf32, #tpu.memory_space<smem>>
    %114 = vector.broadcast %113 : f32 to vector<8x128xf32>
    %115 = arith.mulf %114, %3 : vector<8x128xf32>
    %116 = arith.addf %112, %115 : vector<8x128xf32>
    %c71 = arith.constant 71 : index
    %117 = memref.load %arg2[%c71] : memref<96xf32, #tpu.memory_space<smem>>
    %118 = vector.broadcast %117 : f32 to vector<8x128xf32>
    %119 = arith.mulf %118, %5 : vector<8x128xf32>
    %120 = arith.addf %116, %119 : vector<8x128xf32>
    %c7_8 = arith.constant 7 : index
    %121 = memref.load %arg3[%c7_8] : memref<32xf32, #tpu.memory_space<smem>>
    %122 = vector.broadcast %121 : f32 to vector<8x128xf32>
    %123 = arith.addf %120, %122 : vector<8x128xf32>
    %124 = arith.maximumf %109, %123 : vector<8x128xf32>
    %c8 = arith.constant 8 : index
    %125 = memref.load %arg2[%c8] : memref<96xf32, #tpu.memory_space<smem>>
    %126 = vector.broadcast %125 : f32 to vector<8x128xf32>
    %127 = arith.mulf %126, %4 : vector<8x128xf32>
    %c40 = arith.constant 40 : index
    %128 = memref.load %arg2[%c40] : memref<96xf32, #tpu.memory_space<smem>>
    %129 = vector.broadcast %128 : f32 to vector<8x128xf32>
    %130 = arith.mulf %129, %3 : vector<8x128xf32>
    %131 = arith.addf %127, %130 : vector<8x128xf32>
    %c72 = arith.constant 72 : index
    %132 = memref.load %arg2[%c72] : memref<96xf32, #tpu.memory_space<smem>>
    %133 = vector.broadcast %132 : f32 to vector<8x128xf32>
    %134 = arith.mulf %133, %5 : vector<8x128xf32>
    %135 = arith.addf %131, %134 : vector<8x128xf32>
    %c8_9 = arith.constant 8 : index
    %136 = memref.load %arg3[%c8_9] : memref<32xf32, #tpu.memory_space<smem>>
    %137 = vector.broadcast %136 : f32 to vector<8x128xf32>
    %138 = arith.addf %135, %137 : vector<8x128xf32>
    %139 = arith.maximumf %124, %138 : vector<8x128xf32>
    %c9 = arith.constant 9 : index
    %140 = memref.load %arg2[%c9] : memref<96xf32, #tpu.memory_space<smem>>
    %141 = vector.broadcast %140 : f32 to vector<8x128xf32>
    %142 = arith.mulf %141, %4 : vector<8x128xf32>
    %c41 = arith.constant 41 : index
    %143 = memref.load %arg2[%c41] : memref<96xf32, #tpu.memory_space<smem>>
    %144 = vector.broadcast %143 : f32 to vector<8x128xf32>
    %145 = arith.mulf %144, %3 : vector<8x128xf32>
    %146 = arith.addf %142, %145 : vector<8x128xf32>
    %c73 = arith.constant 73 : index
    %147 = memref.load %arg2[%c73] : memref<96xf32, #tpu.memory_space<smem>>
    %148 = vector.broadcast %147 : f32 to vector<8x128xf32>
    %149 = arith.mulf %148, %5 : vector<8x128xf32>
    %150 = arith.addf %146, %149 : vector<8x128xf32>
    %c9_10 = arith.constant 9 : index
    %151 = memref.load %arg3[%c9_10] : memref<32xf32, #tpu.memory_space<smem>>
    %152 = vector.broadcast %151 : f32 to vector<8x128xf32>
    %153 = arith.addf %150, %152 : vector<8x128xf32>
    %154 = arith.maximumf %139, %153 : vector<8x128xf32>
    %c10 = arith.constant 10 : index
    %155 = memref.load %arg2[%c10] : memref<96xf32, #tpu.memory_space<smem>>
    %156 = vector.broadcast %155 : f32 to vector<8x128xf32>
    %157 = arith.mulf %156, %4 : vector<8x128xf32>
    %c42 = arith.constant 42 : index
    %158 = memref.load %arg2[%c42] : memref<96xf32, #tpu.memory_space<smem>>
    %159 = vector.broadcast %158 : f32 to vector<8x128xf32>
    %160 = arith.mulf %159, %3 : vector<8x128xf32>
    %161 = arith.addf %157, %160 : vector<8x128xf32>
    %c74 = arith.constant 74 : index
    %162 = memref.load %arg2[%c74] : memref<96xf32, #tpu.memory_space<smem>>
    %163 = vector.broadcast %162 : f32 to vector<8x128xf32>
    %164 = arith.mulf %163, %5 : vector<8x128xf32>
    %165 = arith.addf %161, %164 : vector<8x128xf32>
    %c10_11 = arith.constant 10 : index
    %166 = memref.load %arg3[%c10_11] : memref<32xf32, #tpu.memory_space<smem>>
    %167 = vector.broadcast %166 : f32 to vector<8x128xf32>
    %168 = arith.addf %165, %167 : vector<8x128xf32>
    %169 = arith.maximumf %154, %168 : vector<8x128xf32>
    %c11 = arith.constant 11 : index
    %170 = memref.load %arg2[%c11] : memref<96xf32, #tpu.memory_space<smem>>
    %171 = vector.broadcast %170 : f32 to vector<8x128xf32>
    %172 = arith.mulf %171, %4 : vector<8x128xf32>
    %c43 = arith.constant 43 : index
    %173 = memref.load %arg2[%c43] : memref<96xf32, #tpu.memory_space<smem>>
    %174 = vector.broadcast %173 : f32 to vector<8x128xf32>
    %175 = arith.mulf %174, %3 : vector<8x128xf32>
    %176 = arith.addf %172, %175 : vector<8x128xf32>
    %c75 = arith.constant 75 : index
    %177 = memref.load %arg2[%c75] : memref<96xf32, #tpu.memory_space<smem>>
    %178 = vector.broadcast %177 : f32 to vector<8x128xf32>
    %179 = arith.mulf %178, %5 : vector<8x128xf32>
    %180 = arith.addf %176, %179 : vector<8x128xf32>
    %c11_12 = arith.constant 11 : index
    %181 = memref.load %arg3[%c11_12] : memref<32xf32, #tpu.memory_space<smem>>
    %182 = vector.broadcast %181 : f32 to vector<8x128xf32>
    %183 = arith.addf %180, %182 : vector<8x128xf32>
    %184 = arith.maximumf %169, %183 : vector<8x128xf32>
    %c12 = arith.constant 12 : index
    %185 = memref.load %arg2[%c12] : memref<96xf32, #tpu.memory_space<smem>>
    %186 = vector.broadcast %185 : f32 to vector<8x128xf32>
    %187 = arith.mulf %186, %4 : vector<8x128xf32>
    %c44 = arith.constant 44 : index
    %188 = memref.load %arg2[%c44] : memref<96xf32, #tpu.memory_space<smem>>
    %189 = vector.broadcast %188 : f32 to vector<8x128xf32>
    %190 = arith.mulf %189, %3 : vector<8x128xf32>
    %191 = arith.addf %187, %190 : vector<8x128xf32>
    %c76 = arith.constant 76 : index
    %192 = memref.load %arg2[%c76] : memref<96xf32, #tpu.memory_space<smem>>
    %193 = vector.broadcast %192 : f32 to vector<8x128xf32>
    %194 = arith.mulf %193, %5 : vector<8x128xf32>
    %195 = arith.addf %191, %194 : vector<8x128xf32>
    %c12_13 = arith.constant 12 : index
    %196 = memref.load %arg3[%c12_13] : memref<32xf32, #tpu.memory_space<smem>>
    %197 = vector.broadcast %196 : f32 to vector<8x128xf32>
    %198 = arith.addf %195, %197 : vector<8x128xf32>
    %199 = arith.maximumf %184, %198 : vector<8x128xf32>
    %c13 = arith.constant 13 : index
    %200 = memref.load %arg2[%c13] : memref<96xf32, #tpu.memory_space<smem>>
    %201 = vector.broadcast %200 : f32 to vector<8x128xf32>
    %202 = arith.mulf %201, %4 : vector<8x128xf32>
    %c45 = arith.constant 45 : index
    %203 = memref.load %arg2[%c45] : memref<96xf32, #tpu.memory_space<smem>>
    %204 = vector.broadcast %203 : f32 to vector<8x128xf32>
    %205 = arith.mulf %204, %3 : vector<8x128xf32>
    %206 = arith.addf %202, %205 : vector<8x128xf32>
    %c77 = arith.constant 77 : index
    %207 = memref.load %arg2[%c77] : memref<96xf32, #tpu.memory_space<smem>>
    %208 = vector.broadcast %207 : f32 to vector<8x128xf32>
    %209 = arith.mulf %208, %5 : vector<8x128xf32>
    %210 = arith.addf %206, %209 : vector<8x128xf32>
    %c13_14 = arith.constant 13 : index
    %211 = memref.load %arg3[%c13_14] : memref<32xf32, #tpu.memory_space<smem>>
    %212 = vector.broadcast %211 : f32 to vector<8x128xf32>
    %213 = arith.addf %210, %212 : vector<8x128xf32>
    %214 = arith.maximumf %199, %213 : vector<8x128xf32>
    %c14 = arith.constant 14 : index
    %215 = memref.load %arg2[%c14] : memref<96xf32, #tpu.memory_space<smem>>
    %216 = vector.broadcast %215 : f32 to vector<8x128xf32>
    %217 = arith.mulf %216, %4 : vector<8x128xf32>
    %c46 = arith.constant 46 : index
    %218 = memref.load %arg2[%c46] : memref<96xf32, #tpu.memory_space<smem>>
    %219 = vector.broadcast %218 : f32 to vector<8x128xf32>
    %220 = arith.mulf %219, %3 : vector<8x128xf32>
    %221 = arith.addf %217, %220 : vector<8x128xf32>
    %c78 = arith.constant 78 : index
    %222 = memref.load %arg2[%c78] : memref<96xf32, #tpu.memory_space<smem>>
    %223 = vector.broadcast %222 : f32 to vector<8x128xf32>
    %224 = arith.mulf %223, %5 : vector<8x128xf32>
    %225 = arith.addf %221, %224 : vector<8x128xf32>
    %c14_15 = arith.constant 14 : index
    %226 = memref.load %arg3[%c14_15] : memref<32xf32, #tpu.memory_space<smem>>
    %227 = vector.broadcast %226 : f32 to vector<8x128xf32>
    %228 = arith.addf %225, %227 : vector<8x128xf32>
    %229 = arith.maximumf %214, %228 : vector<8x128xf32>
    %c15 = arith.constant 15 : index
    %230 = memref.load %arg2[%c15] : memref<96xf32, #tpu.memory_space<smem>>
    %231 = vector.broadcast %230 : f32 to vector<8x128xf32>
    %232 = arith.mulf %231, %4 : vector<8x128xf32>
    %c47 = arith.constant 47 : index
    %233 = memref.load %arg2[%c47] : memref<96xf32, #tpu.memory_space<smem>>
    %234 = vector.broadcast %233 : f32 to vector<8x128xf32>
    %235 = arith.mulf %234, %3 : vector<8x128xf32>
    %236 = arith.addf %232, %235 : vector<8x128xf32>
    %c79 = arith.constant 79 : index
    %237 = memref.load %arg2[%c79] : memref<96xf32, #tpu.memory_space<smem>>
    %238 = vector.broadcast %237 : f32 to vector<8x128xf32>
    %239 = arith.mulf %238, %5 : vector<8x128xf32>
    %240 = arith.addf %236, %239 : vector<8x128xf32>
    %c15_16 = arith.constant 15 : index
    %241 = memref.load %arg3[%c15_16] : memref<32xf32, #tpu.memory_space<smem>>
    %242 = vector.broadcast %241 : f32 to vector<8x128xf32>
    %243 = arith.addf %240, %242 : vector<8x128xf32>
    %244 = arith.maximumf %229, %243 : vector<8x128xf32>
    %c16 = arith.constant 16 : index
    %245 = memref.load %arg2[%c16] : memref<96xf32, #tpu.memory_space<smem>>
    %246 = vector.broadcast %245 : f32 to vector<8x128xf32>
    %247 = arith.mulf %246, %4 : vector<8x128xf32>
    %c48 = arith.constant 48 : index
    %248 = memref.load %arg2[%c48] : memref<96xf32, #tpu.memory_space<smem>>
    %249 = vector.broadcast %248 : f32 to vector<8x128xf32>
    %250 = arith.mulf %249, %3 : vector<8x128xf32>
    %251 = arith.addf %247, %250 : vector<8x128xf32>
    %c80 = arith.constant 80 : index
    %252 = memref.load %arg2[%c80] : memref<96xf32, #tpu.memory_space<smem>>
    %253 = vector.broadcast %252 : f32 to vector<8x128xf32>
    %254 = arith.mulf %253, %5 : vector<8x128xf32>
    %255 = arith.addf %251, %254 : vector<8x128xf32>
    %c16_17 = arith.constant 16 : index
    %256 = memref.load %arg3[%c16_17] : memref<32xf32, #tpu.memory_space<smem>>
    %257 = vector.broadcast %256 : f32 to vector<8x128xf32>
    %258 = arith.addf %255, %257 : vector<8x128xf32>
    %259 = arith.maximumf %244, %258 : vector<8x128xf32>
    %c17 = arith.constant 17 : index
    %260 = memref.load %arg2[%c17] : memref<96xf32, #tpu.memory_space<smem>>
    %261 = vector.broadcast %260 : f32 to vector<8x128xf32>
    %262 = arith.mulf %261, %4 : vector<8x128xf32>
    %c49 = arith.constant 49 : index
    %263 = memref.load %arg2[%c49] : memref<96xf32, #tpu.memory_space<smem>>
    %264 = vector.broadcast %263 : f32 to vector<8x128xf32>
    %265 = arith.mulf %264, %3 : vector<8x128xf32>
    %266 = arith.addf %262, %265 : vector<8x128xf32>
    %c81 = arith.constant 81 : index
    %267 = memref.load %arg2[%c81] : memref<96xf32, #tpu.memory_space<smem>>
    %268 = vector.broadcast %267 : f32 to vector<8x128xf32>
    %269 = arith.mulf %268, %5 : vector<8x128xf32>
    %270 = arith.addf %266, %269 : vector<8x128xf32>
    %c17_18 = arith.constant 17 : index
    %271 = memref.load %arg3[%c17_18] : memref<32xf32, #tpu.memory_space<smem>>
    %272 = vector.broadcast %271 : f32 to vector<8x128xf32>
    %273 = arith.addf %270, %272 : vector<8x128xf32>
    %274 = arith.maximumf %259, %273 : vector<8x128xf32>
    %c18 = arith.constant 18 : index
    %275 = memref.load %arg2[%c18] : memref<96xf32, #tpu.memory_space<smem>>
    %276 = vector.broadcast %275 : f32 to vector<8x128xf32>
    %277 = arith.mulf %276, %4 : vector<8x128xf32>
    %c50 = arith.constant 50 : index
    %278 = memref.load %arg2[%c50] : memref<96xf32, #tpu.memory_space<smem>>
    %279 = vector.broadcast %278 : f32 to vector<8x128xf32>
    %280 = arith.mulf %279, %3 : vector<8x128xf32>
    %281 = arith.addf %277, %280 : vector<8x128xf32>
    %c82 = arith.constant 82 : index
    %282 = memref.load %arg2[%c82] : memref<96xf32, #tpu.memory_space<smem>>
    %283 = vector.broadcast %282 : f32 to vector<8x128xf32>
    %284 = arith.mulf %283, %5 : vector<8x128xf32>
    %285 = arith.addf %281, %284 : vector<8x128xf32>
    %c18_19 = arith.constant 18 : index
    %286 = memref.load %arg3[%c18_19] : memref<32xf32, #tpu.memory_space<smem>>
    %287 = vector.broadcast %286 : f32 to vector<8x128xf32>
    %288 = arith.addf %285, %287 : vector<8x128xf32>
    %289 = arith.maximumf %274, %288 : vector<8x128xf32>
    %c19 = arith.constant 19 : index
    %290 = memref.load %arg2[%c19] : memref<96xf32, #tpu.memory_space<smem>>
    %291 = vector.broadcast %290 : f32 to vector<8x128xf32>
    %292 = arith.mulf %291, %4 : vector<8x128xf32>
    %c51 = arith.constant 51 : index
    %293 = memref.load %arg2[%c51] : memref<96xf32, #tpu.memory_space<smem>>
    %294 = vector.broadcast %293 : f32 to vector<8x128xf32>
    %295 = arith.mulf %294, %3 : vector<8x128xf32>
    %296 = arith.addf %292, %295 : vector<8x128xf32>
    %c83 = arith.constant 83 : index
    %297 = memref.load %arg2[%c83] : memref<96xf32, #tpu.memory_space<smem>>
    %298 = vector.broadcast %297 : f32 to vector<8x128xf32>
    %299 = arith.mulf %298, %5 : vector<8x128xf32>
    %300 = arith.addf %296, %299 : vector<8x128xf32>
    %c19_20 = arith.constant 19 : index
    %301 = memref.load %arg3[%c19_20] : memref<32xf32, #tpu.memory_space<smem>>
    %302 = vector.broadcast %301 : f32 to vector<8x128xf32>
    %303 = arith.addf %300, %302 : vector<8x128xf32>
    %304 = arith.maximumf %289, %303 : vector<8x128xf32>
    %c20 = arith.constant 20 : index
    %305 = memref.load %arg2[%c20] : memref<96xf32, #tpu.memory_space<smem>>
    %306 = vector.broadcast %305 : f32 to vector<8x128xf32>
    %307 = arith.mulf %306, %4 : vector<8x128xf32>
    %c52 = arith.constant 52 : index
    %308 = memref.load %arg2[%c52] : memref<96xf32, #tpu.memory_space<smem>>
    %309 = vector.broadcast %308 : f32 to vector<8x128xf32>
    %310 = arith.mulf %309, %3 : vector<8x128xf32>
    %311 = arith.addf %307, %310 : vector<8x128xf32>
    %c84 = arith.constant 84 : index
    %312 = memref.load %arg2[%c84] : memref<96xf32, #tpu.memory_space<smem>>
    %313 = vector.broadcast %312 : f32 to vector<8x128xf32>
    %314 = arith.mulf %313, %5 : vector<8x128xf32>
    %315 = arith.addf %311, %314 : vector<8x128xf32>
    %c20_21 = arith.constant 20 : index
    %316 = memref.load %arg3[%c20_21] : memref<32xf32, #tpu.memory_space<smem>>
    %317 = vector.broadcast %316 : f32 to vector<8x128xf32>
    %318 = arith.addf %315, %317 : vector<8x128xf32>
    %319 = arith.maximumf %304, %318 : vector<8x128xf32>
    %c21 = arith.constant 21 : index
    %320 = memref.load %arg2[%c21] : memref<96xf32, #tpu.memory_space<smem>>
    %321 = vector.broadcast %320 : f32 to vector<8x128xf32>
    %322 = arith.mulf %321, %4 : vector<8x128xf32>
    %c53 = arith.constant 53 : index
    %323 = memref.load %arg2[%c53] : memref<96xf32, #tpu.memory_space<smem>>
    %324 = vector.broadcast %323 : f32 to vector<8x128xf32>
    %325 = arith.mulf %324, %3 : vector<8x128xf32>
    %326 = arith.addf %322, %325 : vector<8x128xf32>
    %c85 = arith.constant 85 : index
    %327 = memref.load %arg2[%c85] : memref<96xf32, #tpu.memory_space<smem>>
    %328 = vector.broadcast %327 : f32 to vector<8x128xf32>
    %329 = arith.mulf %328, %5 : vector<8x128xf32>
    %330 = arith.addf %326, %329 : vector<8x128xf32>
    %c21_22 = arith.constant 21 : index
    %331 = memref.load %arg3[%c21_22] : memref<32xf32, #tpu.memory_space<smem>>
    %332 = vector.broadcast %331 : f32 to vector<8x128xf32>
    %333 = arith.addf %330, %332 : vector<8x128xf32>
    %334 = arith.maximumf %319, %333 : vector<8x128xf32>
    %c22 = arith.constant 22 : index
    %335 = memref.load %arg2[%c22] : memref<96xf32, #tpu.memory_space<smem>>
    %336 = vector.broadcast %335 : f32 to vector<8x128xf32>
    %337 = arith.mulf %336, %4 : vector<8x128xf32>
    %c54 = arith.constant 54 : index
    %338 = memref.load %arg2[%c54] : memref<96xf32, #tpu.memory_space<smem>>
    %339 = vector.broadcast %338 : f32 to vector<8x128xf32>
    %340 = arith.mulf %339, %3 : vector<8x128xf32>
    %341 = arith.addf %337, %340 : vector<8x128xf32>
    %c86 = arith.constant 86 : index
    %342 = memref.load %arg2[%c86] : memref<96xf32, #tpu.memory_space<smem>>
    %343 = vector.broadcast %342 : f32 to vector<8x128xf32>
    %344 = arith.mulf %343, %5 : vector<8x128xf32>
    %345 = arith.addf %341, %344 : vector<8x128xf32>
    %c22_23 = arith.constant 22 : index
    %346 = memref.load %arg3[%c22_23] : memref<32xf32, #tpu.memory_space<smem>>
    %347 = vector.broadcast %346 : f32 to vector<8x128xf32>
    %348 = arith.addf %345, %347 : vector<8x128xf32>
    %349 = arith.maximumf %334, %348 : vector<8x128xf32>
    %c23 = arith.constant 23 : index
    %350 = memref.load %arg2[%c23] : memref<96xf32, #tpu.memory_space<smem>>
    %351 = vector.broadcast %350 : f32 to vector<8x128xf32>
    %352 = arith.mulf %351, %4 : vector<8x128xf32>
    %c55 = arith.constant 55 : index
    %353 = memref.load %arg2[%c55] : memref<96xf32, #tpu.memory_space<smem>>
    %354 = vector.broadcast %353 : f32 to vector<8x128xf32>
    %355 = arith.mulf %354, %3 : vector<8x128xf32>
    %356 = arith.addf %352, %355 : vector<8x128xf32>
    %c87 = arith.constant 87 : index
    %357 = memref.load %arg2[%c87] : memref<96xf32, #tpu.memory_space<smem>>
    %358 = vector.broadcast %357 : f32 to vector<8x128xf32>
    %359 = arith.mulf %358, %5 : vector<8x128xf32>
    %360 = arith.addf %356, %359 : vector<8x128xf32>
    %c23_24 = arith.constant 23 : index
    %361 = memref.load %arg3[%c23_24] : memref<32xf32, #tpu.memory_space<smem>>
    %362 = vector.broadcast %361 : f32 to vector<8x128xf32>
    %363 = arith.addf %360, %362 : vector<8x128xf32>
    %364 = arith.maximumf %349, %363 : vector<8x128xf32>
    %c24 = arith.constant 24 : index
    %365 = memref.load %arg2[%c24] : memref<96xf32, #tpu.memory_space<smem>>
    %366 = vector.broadcast %365 : f32 to vector<8x128xf32>
    %367 = arith.mulf %366, %4 : vector<8x128xf32>
    %c56 = arith.constant 56 : index
    %368 = memref.load %arg2[%c56] : memref<96xf32, #tpu.memory_space<smem>>
    %369 = vector.broadcast %368 : f32 to vector<8x128xf32>
    %370 = arith.mulf %369, %3 : vector<8x128xf32>
    %371 = arith.addf %367, %370 : vector<8x128xf32>
    %c88 = arith.constant 88 : index
    %372 = memref.load %arg2[%c88] : memref<96xf32, #tpu.memory_space<smem>>
    %373 = vector.broadcast %372 : f32 to vector<8x128xf32>
    %374 = arith.mulf %373, %5 : vector<8x128xf32>
    %375 = arith.addf %371, %374 : vector<8x128xf32>
    %c24_25 = arith.constant 24 : index
    %376 = memref.load %arg3[%c24_25] : memref<32xf32, #tpu.memory_space<smem>>
    %377 = vector.broadcast %376 : f32 to vector<8x128xf32>
    %378 = arith.addf %375, %377 : vector<8x128xf32>
    %379 = arith.maximumf %364, %378 : vector<8x128xf32>
    %c25 = arith.constant 25 : index
    %380 = memref.load %arg2[%c25] : memref<96xf32, #tpu.memory_space<smem>>
    %381 = vector.broadcast %380 : f32 to vector<8x128xf32>
    %382 = arith.mulf %381, %4 : vector<8x128xf32>
    %c57 = arith.constant 57 : index
    %383 = memref.load %arg2[%c57] : memref<96xf32, #tpu.memory_space<smem>>
    %384 = vector.broadcast %383 : f32 to vector<8x128xf32>
    %385 = arith.mulf %384, %3 : vector<8x128xf32>
    %386 = arith.addf %382, %385 : vector<8x128xf32>
    %c89 = arith.constant 89 : index
    %387 = memref.load %arg2[%c89] : memref<96xf32, #tpu.memory_space<smem>>
    %388 = vector.broadcast %387 : f32 to vector<8x128xf32>
    %389 = arith.mulf %388, %5 : vector<8x128xf32>
    %390 = arith.addf %386, %389 : vector<8x128xf32>
    %c25_26 = arith.constant 25 : index
    %391 = memref.load %arg3[%c25_26] : memref<32xf32, #tpu.memory_space<smem>>
    %392 = vector.broadcast %391 : f32 to vector<8x128xf32>
    %393 = arith.addf %390, %392 : vector<8x128xf32>
    %394 = arith.maximumf %379, %393 : vector<8x128xf32>
    %c26 = arith.constant 26 : index
    %395 = memref.load %arg2[%c26] : memref<96xf32, #tpu.memory_space<smem>>
    %396 = vector.broadcast %395 : f32 to vector<8x128xf32>
    %397 = arith.mulf %396, %4 : vector<8x128xf32>
    %c58 = arith.constant 58 : index
    %398 = memref.load %arg2[%c58] : memref<96xf32, #tpu.memory_space<smem>>
    %399 = vector.broadcast %398 : f32 to vector<8x128xf32>
    %400 = arith.mulf %399, %3 : vector<8x128xf32>
    %401 = arith.addf %397, %400 : vector<8x128xf32>
    %c90 = arith.constant 90 : index
    %402 = memref.load %arg2[%c90] : memref<96xf32, #tpu.memory_space<smem>>
    %403 = vector.broadcast %402 : f32 to vector<8x128xf32>
    %404 = arith.mulf %403, %5 : vector<8x128xf32>
    %405 = arith.addf %401, %404 : vector<8x128xf32>
    %c26_27 = arith.constant 26 : index
    %406 = memref.load %arg3[%c26_27] : memref<32xf32, #tpu.memory_space<smem>>
    %407 = vector.broadcast %406 : f32 to vector<8x128xf32>
    %408 = arith.addf %405, %407 : vector<8x128xf32>
    %409 = arith.maximumf %394, %408 : vector<8x128xf32>
    %c27 = arith.constant 27 : index
    %410 = memref.load %arg2[%c27] : memref<96xf32, #tpu.memory_space<smem>>
    %411 = vector.broadcast %410 : f32 to vector<8x128xf32>
    %412 = arith.mulf %411, %4 : vector<8x128xf32>
    %c59 = arith.constant 59 : index
    %413 = memref.load %arg2[%c59] : memref<96xf32, #tpu.memory_space<smem>>
    %414 = vector.broadcast %413 : f32 to vector<8x128xf32>
    %415 = arith.mulf %414, %3 : vector<8x128xf32>
    %416 = arith.addf %412, %415 : vector<8x128xf32>
    %c91 = arith.constant 91 : index
    %417 = memref.load %arg2[%c91] : memref<96xf32, #tpu.memory_space<smem>>
    %418 = vector.broadcast %417 : f32 to vector<8x128xf32>
    %419 = arith.mulf %418, %5 : vector<8x128xf32>
    %420 = arith.addf %416, %419 : vector<8x128xf32>
    %c27_28 = arith.constant 27 : index
    %421 = memref.load %arg3[%c27_28] : memref<32xf32, #tpu.memory_space<smem>>
    %422 = vector.broadcast %421 : f32 to vector<8x128xf32>
    %423 = arith.addf %420, %422 : vector<8x128xf32>
    %424 = arith.maximumf %409, %423 : vector<8x128xf32>
    %c28 = arith.constant 28 : index
    %425 = memref.load %arg2[%c28] : memref<96xf32, #tpu.memory_space<smem>>
    %426 = vector.broadcast %425 : f32 to vector<8x128xf32>
    %427 = arith.mulf %426, %4 : vector<8x128xf32>
    %c60 = arith.constant 60 : index
    %428 = memref.load %arg2[%c60] : memref<96xf32, #tpu.memory_space<smem>>
    %429 = vector.broadcast %428 : f32 to vector<8x128xf32>
    %430 = arith.mulf %429, %3 : vector<8x128xf32>
    %431 = arith.addf %427, %430 : vector<8x128xf32>
    %c92 = arith.constant 92 : index
    %432 = memref.load %arg2[%c92] : memref<96xf32, #tpu.memory_space<smem>>
    %433 = vector.broadcast %432 : f32 to vector<8x128xf32>
    %434 = arith.mulf %433, %5 : vector<8x128xf32>
    %435 = arith.addf %431, %434 : vector<8x128xf32>
    %c28_29 = arith.constant 28 : index
    %436 = memref.load %arg3[%c28_29] : memref<32xf32, #tpu.memory_space<smem>>
    %437 = vector.broadcast %436 : f32 to vector<8x128xf32>
    %438 = arith.addf %435, %437 : vector<8x128xf32>
    %439 = arith.maximumf %424, %438 : vector<8x128xf32>
    %c29 = arith.constant 29 : index
    %440 = memref.load %arg2[%c29] : memref<96xf32, #tpu.memory_space<smem>>
    %441 = vector.broadcast %440 : f32 to vector<8x128xf32>
    %442 = arith.mulf %441, %4 : vector<8x128xf32>
    %c61 = arith.constant 61 : index
    %443 = memref.load %arg2[%c61] : memref<96xf32, #tpu.memory_space<smem>>
    %444 = vector.broadcast %443 : f32 to vector<8x128xf32>
    %445 = arith.mulf %444, %3 : vector<8x128xf32>
    %446 = arith.addf %442, %445 : vector<8x128xf32>
    %c93 = arith.constant 93 : index
    %447 = memref.load %arg2[%c93] : memref<96xf32, #tpu.memory_space<smem>>
    %448 = vector.broadcast %447 : f32 to vector<8x128xf32>
    %449 = arith.mulf %448, %5 : vector<8x128xf32>
    %450 = arith.addf %446, %449 : vector<8x128xf32>
    %c29_30 = arith.constant 29 : index
    %451 = memref.load %arg3[%c29_30] : memref<32xf32, #tpu.memory_space<smem>>
    %452 = vector.broadcast %451 : f32 to vector<8x128xf32>
    %453 = arith.addf %450, %452 : vector<8x128xf32>
    %454 = arith.maximumf %439, %453 : vector<8x128xf32>
    %c30 = arith.constant 30 : index
    %455 = memref.load %arg2[%c30] : memref<96xf32, #tpu.memory_space<smem>>
    %456 = vector.broadcast %455 : f32 to vector<8x128xf32>
    %457 = arith.mulf %456, %4 : vector<8x128xf32>
    %c62 = arith.constant 62 : index
    %458 = memref.load %arg2[%c62] : memref<96xf32, #tpu.memory_space<smem>>
    %459 = vector.broadcast %458 : f32 to vector<8x128xf32>
    %460 = arith.mulf %459, %3 : vector<8x128xf32>
    %461 = arith.addf %457, %460 : vector<8x128xf32>
    %c94 = arith.constant 94 : index
    %462 = memref.load %arg2[%c94] : memref<96xf32, #tpu.memory_space<smem>>
    %463 = vector.broadcast %462 : f32 to vector<8x128xf32>
    %464 = arith.mulf %463, %5 : vector<8x128xf32>
    %465 = arith.addf %461, %464 : vector<8x128xf32>
    %c30_31 = arith.constant 30 : index
    %466 = memref.load %arg3[%c30_31] : memref<32xf32, #tpu.memory_space<smem>>
    %467 = vector.broadcast %466 : f32 to vector<8x128xf32>
    %468 = arith.addf %465, %467 : vector<8x128xf32>
    %469 = arith.maximumf %454, %468 : vector<8x128xf32>
    %c31 = arith.constant 31 : index
    %470 = memref.load %arg2[%c31] : memref<96xf32, #tpu.memory_space<smem>>
    %471 = vector.broadcast %470 : f32 to vector<8x128xf32>
    %472 = arith.mulf %471, %4 : vector<8x128xf32>
    %c63 = arith.constant 63 : index
    %473 = memref.load %arg2[%c63] : memref<96xf32, #tpu.memory_space<smem>>
    %474 = vector.broadcast %473 : f32 to vector<8x128xf32>
    %475 = arith.mulf %474, %3 : vector<8x128xf32>
    %476 = arith.addf %472, %475 : vector<8x128xf32>
    %c95 = arith.constant 95 : index
    %477 = memref.load %arg2[%c95] : memref<96xf32, #tpu.memory_space<smem>>
    %478 = vector.broadcast %477 : f32 to vector<8x128xf32>
    %479 = arith.mulf %478, %5 : vector<8x128xf32>
    %480 = arith.addf %476, %479 : vector<8x128xf32>
    %c31_32 = arith.constant 31 : index
    %481 = memref.load %arg3[%c31_32] : memref<32xf32, #tpu.memory_space<smem>>
    %482 = vector.broadcast %481 : f32 to vector<8x128xf32>
    %483 = arith.addf %480, %482 : vector<8x128xf32>
    %484 = arith.maximumf %469, %483 : vector<8x128xf32>
    %cst = arith.constant 0.000000e+00 : f32
    %485 = vector.broadcast %cst : f32 to vector<8x128xf32>
    %486 = arith.maximumf %484, %485 : vector<8x128xf32>
    %487 = arith.index_cast %1 : i32 to index
    %c0_33 = arith.constant 0 : index
    %488 = vector.load %arg4[%487, %c0_33] : memref<8x128xf32, #tpu.memory_space<vmem>>, vector<8x128xf32>
    tpu.vector_store %arg4[%487, %c0_33], %486 {strides = array<i32>} : memref<8x128xf32, #tpu.memory_space<vmem>>, vector<8x128xf32>,
    %c1_i32_34 = arith.constant 1 : i32
    return
  }
  func.func @transform_0(%arg0: i32) -> (i32, i32) {
    %c0_i32 = arith.constant 0 : i32
    %c0_i32_0 = arith.constant 0 : i32
    return %arg0, %c0_i32 : i32, i32
  }
  func.func @transform_1(%arg0: i32) -> i32 {
    %c0_i32 = arith.constant 0 : i32
    %c0_i32_0 = arith.constant 0 : i32
    return %c0_i32 : i32
  }
  func.func @transform_2(%arg0: i32) -> i32 {
    %c0_i32 = arith.constant 0 : i32
    %c0_i32_0 = arith.constant 0 : i32
    return %c0_i32 : i32
  }
  func.func @transform_3(%arg0: i32) -> (i32, i32) {
    %c0_i32 = arith.constant 0 : i32
    %c0_i32_0 = arith.constant 0 : i32
    return %arg0, %c0_i32 : i32, i32
  }
}

</mosaic_0001>

<bundles_post_ra>
// kernel: tpu_custom_call.1
= control target key start
LH: loop header
LB: loop body
LE: loop exit
PB: predicated region body
PF: predicated region fallthrough
CT: control target
= control target key end

     0   :  { %s1518_s0 = inlined_call_operand.hbm [shape: f32[8,128], index: 0, kind: input, shape index: {}]   ;;  %s1519_s1 = inlined_call_operand.vmem [shape: f32[96], index: 1, kind: input, shape index: {}]   ;;  %s1520_s2 = inlined_call_operand.vmem [shape: f32[32], index: 2, kind: input, shape index: {}]   ;;  %s1521_s3 = inlined_call_operand.hbm [shape: f32[8,128], index: 3, kind: output, shape index: {}]  }
   0x1   :  { %1580 = sst [smem:[#allocation65_spill]] %s1521_s3 }
   0x2   :  { %8 = vsyncpa [#allocation3], 0 }
   0x3   :  { %9 = vsyncpa [#allocation5], 0 }
   0x4   :  { %10 = vsyncpa [#allocation8], 0 }
   0x5   :  { %11 = vsyncpa [#allocation4], 0  ;;  %s28_s14 = sshll.u32 %s1519_s1, 4  ;;  %s759_s15 = smov [#allocation2]   ;;  %s29_s14 = int_to_ptr.vmem [resolvable:$true] %s28_s14 }
   0x6   :  { %s18_s16 = sshll.u32 %s759_s15, 4  ;;  %s19_s16 = int_to_ptr.vmem [resolvable:$true] %s18_s16 }
   0x7   :  { %s695_s17 = scalar_lea.vmem %s19_s16, 128  ;;  %p700_p1 = scmp.lt.s32.totalorder %s19_s16, %s19_s16 }
   0x8   :  { %p696_p0 = scmp.ne.s32.totalorder %s19_s16, %s695_s17  ;;  %p701_p2 = scmp.lt.s32.totalorder %s695_s17, %s695_s17 }
   0xa   :  { %p702_p3 = por %p701_p2, %p700_p1 }
   0xc   :  { %p703_p4 = pnand %p702_p3, %p696_p0 }
   0xe   :  { %706 = shalt.err (!%p703_p4)
}
   0xf   :  { %21 = dma.hbm_to_vmem [thread:$0]  %s1518_s0, 128, %s19_s16, [#allocation3]  }
  0x10   :  { %s707_s20 = scalar_lea.vmem %s29_s14, 16  ;;  %p712_p6 = scmp.lt.s32.totalorder %s29_s14, %s29_s14 }
  0x11   :  { %p708_p5 = scmp.ne.s32.totalorder %s29_s14, %s707_s20  ;;  %p713_p7 = scmp.lt.s32.totalorder %s707_s20, %s707_s20 }
  0x13   :  { %p714_p8 = por %p713_p7, %p712_p6 }
  0x15   :  { %p715_p9 = pnand %p714_p8, %p708_p5 }
  0x17   :  { %718 = shalt.err (!%p715_p9)
}
  0x18   :  { %s760_s1 = smov [#allocation6]   ;;  %s38_s23 = sshll.u32 %s1520_s2, 4  ;;  %s39_s23 = int_to_ptr.vmem [resolvable:$true] %s38_s23 }
  0x19   :  { %31 = dma.vmem_to_smem %s29_s14, 16, %s760_s1, [#allocation5]  }
  0x1a   :  { %s719_s24 = scalar_lea.vmem %s39_s23, 16  ;;  %p724_p11 = scmp.lt.s32.totalorder %s39_s23, %s39_s23 }
  0x1b   :  { %p720_p10 = scmp.ne.s32.totalorder %s39_s23, %s719_s24  ;;  %p725_p12 = scmp.lt.s32.totalorder %s719_s24, %s719_s24 }
  0x1d   :  { %p726_p13 = por %p725_p12, %p724_p11 }
  0x1f   :  { %p727_p0 = pnand %p726_p13, %p720_p10 }
  0x21   :  { %730 = shalt.err (!%p727_p0)
}
  0x22   :  { %s761_s0 = smov [#allocation7]  }
  0x23   :  { %41 = dma.vmem_to_smem %s39_s23, 16, %s761_s0, [#allocation8]  }
  0x24   :  { %751 = dma.done.wait [#allocation3], 128  }
  0x25   :  { %752 = vsyncadd [#allocation3], 4294967168 }
  0x26   :  { %753 = dma.done.wait [#allocation5], 16  }
  0x27   :  { %754 = vsyncadd [#allocation5], 4294967280 }
  0x28   :  { %755 = dma.done.wait [#allocation8], 16  }
  0x29   :  { %756 = vsyncadd [#allocation8], 4294967280 }
  0x2a   :  { %51 = sfence }
  0x2b   :  { %v794_v0 = vld [vmem:[#allocation2] sm:$0xff]  ;;  %s762_s2 = smov 1   ;;  %s763_s25 = smov 127  }
  0x2c   :  { %53 = vrot.lane.b32.xlu0 %v794_v0, %s762_s2  ;;  %s798_s26 = sld [smem:[#allocation6]] }
  0x2d   :  { %s800_s27 = sld [smem:[#allocation6 + $0x20]] }
  0x2e   :  { %s802_s28 = sld [smem:[#allocation6 + $0x40]] }
  0x2f   :  { %s804_s29 = sld [smem:[#allocation7]] }
  0x30   :  { %55 = vrot.lane.b32.xlu0 %v794_v0, %s763_s25  ;;  %s806_s30 = sld [smem:[#allocation6 + $0x1]] }
  0x31   :  { %s808_s4 = sld [smem:[#allocation6 + $0x21]] }
  0x32   :  { %1581 = sst [smem:[#allocation14_spill]] %s798_s26  ;;  %v58_v3 = vstv %s798_s26 }
  0x33   :  { %s810_s5 = sld [smem:[#allocation6 + $0x41]]  ;;  %v61_v1 = vstv %s800_s27 }
  0x34   :  { %1582 = sst [smem:[#allocation15_spill]] %s802_s28  ;;  %v930_v4 = vmul.f32 %v61_v1, %v794_v0  ;;  %v65_v5 = vstv %s802_s28 }
  0x35   :  { %1583 = sst [smem:[#allocation16_spill]] %s804_s29  ;;  %v69_v7 = vstv %s804_s29 }
  0x36   :  { %1584 = sst [smem:[#allocation17_spill]] %s806_s30  ;;  %v72_v8 = vstv %s806_s30 }
  0x37   :  { %s812_s6 = sld [smem:[#allocation7 + $0x1]]  ;;  %v75_v2 = vstv %s808_s4 }
  0x38   :  { %s814_s7 = sld [smem:[#allocation6 + $0x2]]  ;;  %v939_v9 = vmul.f32 %v75_v2, %v794_v0 }
  0x39   :  { %1585 = sst [smem:[#allocation18_spill]] %s810_s5  ;;  %v79_v11 = vstv %s810_s5 }
  0x3a   :  { %s816_s8 = sld [smem:[#allocation6 + $0x22]] }
  0x3b   :  { %s818_s9 = sld [smem:[#allocation6 + $0x42]] }
  0x3c   :  { %s820_s10 = sld [smem:[#allocation7 + $0x2]] }
  0x3d   :  { %1586 = sst [smem:[#allocation19_spill]] %s812_s6  ;;  %v83_v12 = vstv %s812_s6 }
  0x3e   :  { %1587 = sst [smem:[#allocation20_spill]] %s814_s7  ;;  %v87_v13 = vstv %s814_s7 }
  0x3f   :  { %s822_s11 = sld [smem:[#allocation6 + $0x3]] }
  0x40   :  { %s824_s12 = sld [smem:[#allocation6 + $0x23]]  ;;  %v90_v6 = vstv %s816_s8 }
  0x41   :  { %1588 = sst [smem:[#allocation21_spill]] %s818_s9  ;;  %v951_v15 = vmul.f32 %v90_v6, %v794_v0  ;;  %v94_v16 = vstv %s818_s9 }
  0x42   :  { %1589 = sst [smem:[#allocation22_spill]] %s820_s10  ;;  %v98_v17 = vstv %s820_s10 }
  0x43   :  { %s826_s13 = sld [smem:[#allocation6 + $0x43]] }
  0x44   :  { %s828_s14 = sld [smem:[#allocation7 + $0x3]] }
  0x45   :  { %1590 = sst [smem:[#allocation23_spill]] %s822_s11  ;;  %v102_v19 = vstv %s822_s11 }
  0x46   :  { %s830_s15 = sld [smem:[#allocation6 + $0x4]]  ;;  %v105_v10 = vstv %s824_s12 }
  0x47   :  { %s832_s16 = sld [smem:[#allocation6 + $0x24]]  ;;  %v960_v20 = vmul.f32 %v105_v10, %v794_v0 }
  0x48   :  { %s834_s17 = sld [smem:[#allocation6 + $0x44]] }
  0x49   :  { %1591 = sst [smem:[#allocation24_spill]] %s826_s13  ;;  %v109_v21 = vstv %s826_s13 }
  0x4a   :  { %1592 = sst [smem:[#allocation25_spill]] %s828_s14  ;;  %v113_v22 = vstv %s828_s14 }
  0x4b   :  { %s836_s18 = sld [smem:[#allocation7 + $0x4]] }
  0x4c   :  { %1593 = sst [smem:[#allocation26_spill]] %s830_s15  ;;  %v117_v23 = vstv %s830_s15 }
  0x4d   :  { %s838_s19 = sld [smem:[#allocation6 + $0x5]]  ;;  %v120_v14 = vstv %s832_s16 }
  0x4e   :  { %1594 = sst [smem:[#allocation27_spill]] %s834_s17  ;;  %v968_v24 = vmul.f32 %v120_v14, %v794_v0  ;;  %v124_v25 = vstv %s834_s17 }
  0x4f   :  { %s840_s20 = sld [smem:[#allocation6 + $0x25]] }
  0x50   :  { %s842_s1 = sld [smem:[#allocation6 + $0x45]] }
  0x51   :  { %1595 = sst [smem:[#allocation28_spill]] %s836_s18 }
  0x52   :  { %s844_s21 = sld [smem:[#allocation7 + $0x5]] }
  0x53   :  { %1596 = sst [smem:[#allocation29_spill]] %s838_s19 }
  0x54   :  { %s846_s22 = sld [smem:[#allocation6 + $0x6]] }
  0x55   :  { %s848_s23 = sld [smem:[#allocation6 + $0x26]]  ;;  %v135_v18 = vstv %s840_s20 }
  0x56   :  { %1597 = sst [smem:[#allocation30_spill]] %s842_s1  ;;  %v977_v29 = vmul.f32 %v135_v18, %v794_v0 }
  0x57   :  { %s850_s24 = sld [smem:[#allocation6 + $0x46]] }
  0x58   :  { %1598 = sst [smem:[#allocation31_spill]] %s844_s21 }
  0x59   :  { %s852_s0 = sld [smem:[#allocation7 + $0x6]] }
  0x5a   :  { %1599 = sst [smem:[#allocation32_spill]] %s846_s22 }
  0x5b   :  { %1600 = sst [smem:[#allocation33_spill]] %s848_s23 }
  0x5c   :  { %s854_s2 = sld [smem:[#allocation6 + $0x7]] }
  0x5d   :  { %1601 = sst [smem:[#allocation34_spill]] %s850_s24 }
  0x5e   :  { %s856_s25 = sld [smem:[#allocation6 + $0x27]] }
  0x5f   :  { %1602 = sst [smem:[#allocation35_spill]] %s852_s0 }
  0x60   :  { %s858_s3 = sld [smem:[#allocation6 + $0x47]] }
  0x61   :  { %s860_s19 = sld [smem:[#allocation7 + $0x7]] }
  0x62   :  { %1603 = sst [smem:[#allocation36_spill]] %s854_s2 }
  0x63   :  { %s862_s18 = sld [smem:[#allocation6 + $0x8]] }
  0x64   :  { %1604 = sst [smem:[#allocation37_spill]] %s856_s25 }
  0x65   :  { %s864_s1 = sld [smem:[#allocation6 + $0x28]] }
  0x66   :  { %1605 = sst [smem:[#allocation38_spill]] %s858_s3 }
  0x67   :  { %1606 = sst [smem:[#allocation39_spill]] %s860_s19 }
  0x68   :  { %s866_s21 = sld [smem:[#allocation6 + $0x48]] }
  0x69   :  { %1607 = sst [smem:[#allocation40_spill]] %s862_s18 }
  0x6a   :  { %s868_s22 = sld [smem:[#allocation7 + $0x8]] }
  0x6b   :  { %1608 = sst [smem:[#allocation41_spill]] %s864_s1 }
  0x6c   :  { %s870_s23 = sld [smem:[#allocation6 + $0x9]] }
  0x6d   :  { %s872_s24 = sld [smem:[#allocation6 + $0x29]] }
  0x6e   :  { %1609 = sst [smem:[#allocation42_spill]] %s866_s21 }
  0x6f   :  { %s874_s0 = sld [smem:[#allocation6 + $0x49]] }
  0x70   :  { %1610 = sst [smem:[#allocation43_spill]] %s868_s22 }
  0x71   :  { %s876_s2 = sld [smem:[#allocation7 + $0x9]] }
  0x72   :  { %1611 = sst [smem:[#allocation44_spill]] %s870_s23 }
  0x73   :  { %s878_s25 = sld [smem:[#allocation6 + $0xa]]  ;;  %v195_v38 = vstv %s872_s24 }
  0x74   :  { %s880_s3 = sld [smem:[#allocation6 + $0x2a]]  ;;  %v1015_v49 = vmul.f32 %v195_v38, %v794_v0 }
  0x75   :  { %1612 = sst [smem:[#allocation45_spill]] %s874_s0 }
  0x76   :  { %s882_s19 = sld [smem:[#allocation6 + $0x4a]] }
  0x77   :  { %1613 = sst [smem:[#allocation46_spill]] %s876_s2 }
  0x78   :  { %s884_s18 = sld [smem:[#allocation7 + $0xa]] }
  0x79   :  { %1614 = sst [smem:[#allocation47_spill]] %s878_s25 }
  0x7a   :  { %s886_s1 = sld [smem:[#allocation6 + $0xb]]  ;;  %v210_v46 = vstv %s880_s3 }
  0x7b   :  { %s888_s21 = sld [smem:[#allocation6 + $0x2b]]  ;;  %v1027_v55 = vmul.f32 %v210_v46, %v794_v0 }
  0x7c   :  { %1615 = sst [smem:[#allocation48_spill]] %s882_s19 }
  0x7d   :  { %s890_s23 = sld [smem:[#allocation6 + $0x4b]] }
  0x7e   :  { %1616 = sst [smem:[#allocation49_spill]] %s884_s18 }
  0x7f   :  { %s892_s22 = sld [smem:[#allocation7 + $0xb]] }
  0x80   :  { %1617 = sst [smem:[#allocation50_spill]] %s886_s1 }
  0x81   :  { %1618 = sst [smem:[#allocation51_spill]] %s888_s21 }
  0x82   :  { %s894_s0 = sld [smem:[#allocation6 + $0xc]] }
  0x83   :  { %1619 = sst [smem:[#allocation52_spill]] %s890_s23 }
  0x84   :  { %s896_s2 = sld [smem:[#allocation6 + $0x2c]] }
  0x85   :  { %1620 = sst [smem:[#allocation53_spill]] %s892_s22 }
  0x86   :  { %s898_s25 = sld [smem:[#allocation6 + $0x4c]] }
  0x87   :  { %s900_s19 = sld [smem:[#allocation7 + $0xc]] }
  0x88   :  { %1621 = sst [smem:[#allocation54_spill]] %s894_s0 }
  0x89   :  { %s902_s18 = sld [smem:[#allocation6 + $0xd]] }
  0x8a   :  { %s904_s1 = sld [smem:[#allocation6 + $0x2d]]  ;;  %v240_v54 = vstv %s896_s2 }
  0x8b   :  { %s906_s21 = sld [smem:[#allocation6 + $0x4d]]  ;;  %v1044_v1 = vmul.f32 %v240_v54, %v794_v0 }
  0x8c   :  { %1622 = sst [smem:[#allocation55_spill]] %s898_s25 }
  0x8d   :  { %1623 = sst [smem:[#allocation56_spill]] %s900_s19 }
  0x8e   :  { %s908_s23 = sld [smem:[#allocation7 + $0xd]] }
  0x8f   :  { %1624 = sst [smem:[#allocation57_spill]] %s902_s18 }
  0x90   :  { %1625 = sst [smem:[#allocation58_spill]] %s904_s1 }
  0x91   :  { %1626 = sst [smem:[#allocation59_spill]] %s906_s21 }
  0x92   :  { %s910_s22 = sld [smem:[#allocation6 + $0xe]] }
  0x93   :  { %s912_s0 = sld [smem:[#allocation6 + $0x2e]] }
  0x94   :  { %1627 = sst [smem:[#allocation60_spill]] %s908_s23 }
  0x95   :  { %s914_s25 = sld [smem:[#allocation6 + $0x4e]] }
  0x96   :  { %s916_s19 = sld [smem:[#allocation7 + $0xe]] }
  0x97   :  { %s918_s18 = sld [smem:[#allocation6 + $0xf]] }
  0x98   :  { %1628 = sst [smem:[#allocation61_spill]] %s910_s22 }
  0x99   :  { %s921_s1 = sld [smem:[#allocation6 + $0x2f]]  ;;  %v270_v6 = vstv %s912_s0 }
  0x9a   :  { %s924_s23 = sld [smem:[#allocation6 + $0x4f]] }
  0x9b   :  { %s926_s22 = sld [smem:[#allocation7 + $0xf]] }
  0x9c   :  { %1629 = sst [smem:[#allocation62_spill]] %s916_s19 }
  0x9d   :  { %s934_s27 = sld [smem:[#allocation6 + $0x10]] }
  0x9e   :  { %s942_s4 = sld [smem:[#allocation6 + $0x30]]  ;;  %v1092_v52 = vpop.permute.xlu0 %53 }
  0x9f   :  { %s1632_s28 = sld [smem:[#allocation33_spill]]  ;;  %v88_v2 = vmul.f32 %v87_v13, %v1092_v52  ;;  %v103_v54 = vmul.f32 %v102_v19, %v1092_v52 }
  0xa0   :  { %s948_s8 = sld [smem:[#allocation6 + $0x50]] }
  0xa1   :  { %1630 = sst [smem:[#allocation63_spill]] %s926_s22 }
  0xa2   :  { %s1633_s29 = sld [smem:[#allocation28_spill]]  ;;  %v1128_v19 = vpop.permute.xlu0 %55 }
  0xa3   :  { %1631 = sst [smem:[#allocation64_spill]] %s934_s27 }
  0xa4   :  { %s1634_s30 = sld [smem:[#allocation29_spill]]  ;;  %v300_v46 = vstv %s942_s4 }
  0xa5   :  { %s1635_s26 = sld [smem:[#allocation37_spill]]  ;;  %v150_v26 = vstv %s1632_s28 }
  0xa6   :  { %s956_s12 = sld [smem:[#allocation7 + $0x10]]  ;;  %v989_v35 = vmul.f32 %v150_v26, %v794_v0  ;;  %v285_v26 = vstv %s921_s1 }
  0xa7   :  { %s1637_s27 = sld [smem:[#allocation30_spill]]  ;;  %v1072_v57 = vmul.f32 %v285_v26, %v794_v0  ;;  %v73_v26 = vmul.f32 %v72_v8, %v1092_v52  ;;  %v66_v8 = vmul.f32 %v65_v5, %v1128_v19 }
  0xa8   :  { %s1638_s6 = sld [smem:[#allocation31_spill]]  ;;  %v128_v27 = vstv %s1633_s29 }
  0xa9   :  { %s1639_s16 = sld [smem:[#allocation32_spill]] }
  0xaa   :  { %s1640_s5 = sld [smem:[#allocation41_spill]]  ;;  %v132_v28 = vstv %s1634_s30 }
  0xab   :  { %s964_s7 = sld [smem:[#allocation6 + $0x11]]  ;;  %v165_v30 = vstv %s1635_s26  ;;  %v133_v5 = vmul.f32 %v132_v28, %v1092_v52 }
  0xac   :  { %1636 = sst [smem:[#allocation33_spill]] %s956_s12  ;;  %v998_v40 = vmul.f32 %v165_v30, %v794_v0 }
  0xad   :  { %s1642_s9 = sld [smem:[#allocation34_spill]]  ;;  %v139_v31 = vstv %s1637_s27 }
  0xae   :  { %s1643_s20 = sld [smem:[#allocation35_spill]]  ;;  %v143_v32 = vstv %s1638_s6 }
  0xaf   :  { %s972_s10 = sld [smem:[#allocation6 + $0x31]]  ;;  %v147_v33 = vstv %s1639_s16 }
  0xb0   :  { %s1644_s11 = sld [smem:[#allocation36_spill]]  ;;  %v180_v34 = vstv %s1640_s5  ;;  %v148_v28 = vmul.f32 %v147_v33, %v1092_v52 }
  0xb1   :  { %1641 = sst [smem:[#allocation37_spill]] %s964_s7  ;;  %v1006_v44 = vmul.f32 %v180_v34, %v794_v0 }
  0xb2   :  { %s1645_s13 = sld [smem:[#allocation38_spill]] }
  0xb3   :  { %s1646_s14 = sld [smem:[#allocation39_spill]]  ;;  %v154_v36 = vstv %s1642_s9 }
  0xb4   :  { %s980_s15 = sld [smem:[#allocation6 + $0x51]]  ;;  %v158_v37 = vstv %s1643_s20  ;;  %v155_v33 = vmul.f32 %v154_v36, %v1128_v19  ;;  %v152_v36 = vadd.f32 %v989_v35, %v148_v28 }
  0xb5   :  { %s1648_s7 = sld [smem:[#allocation40_spill]]  ;;  %v315_v10 = vstv %s972_s10 }
  0xb6   :  { %s1649_s12 = sld [smem:[#allocation42_spill]]  ;;  %v162_v39 = vstv %s1644_s11  ;;  %v1087_v34 = vmul.f32 %v315_v10, %v794_v0  ;;  %v59_v10 = vmul.f32 %v58_v3, %v1092_v52  ;;  %v80_v3 = vmul.f32 %v79_v11, %v1128_v19 }
  0xb7   :  { %s986_s28 = sld [smem:[#allocation7 + $0x11]]  ;;  %v156_v35 = vadd.f32 %v155_v33, %v152_v36 }
  0xb8   :  { %s1652_s17 = sld [smem:[#allocation44_spill]]  ;;  %v169_v41 = vstv %s1645_s13  ;;  %v63_v62 = vadd.f32 %v930_v4, %v59_v10  ;;  %v95_v4 = vmul.f32 %v94_v16, %v1128_v19 }
  0xb9   :  { %s1653_s30 = sld [smem:[#allocation51_spill]]  ;;  %v173_v42 = vstv %s1646_s14 }
  0xba   :  { %1647 = sst [smem:[#allocation41_spill]] %s980_s15  ;;  %v67_v16 = vadd.f32 %v66_v8, %v63_v62 }
  0xbb   :  { %s994_s26 = sld [smem:[#allocation6 + $0x12]]  ;;  %v177_v43 = vstv %s1648_s7 }
  0xbc   :  { %s1655_s15 = sld [smem:[#allocation45_spill]]  ;;  %v184_v45 = vstv %s1649_s12  ;;  %v70_v62 = vadd.f32 %v69_v7, %v67_v16  ;;  %v163_v7 = vmul.f32 %v162_v39, %v1092_v52  ;;  %v170_v39 = vmul.f32 %v169_v41, %v1128_v19 }
  0xbd   :  { %1650 = sst [smem:[#allocation42_spill]] %s986_s28 }
  0xbe   :  { %s1657_s5 = sld [smem:[#allocation47_spill]]  ;;  %v192_v48 = vstv %s1652_s17 }
  0xbf   :  { %s1002_s16 = sld [smem:[#allocation6 + $0x32]]  ;;  %v225_v50 = vstv %s1653_s30 }
  0xc0   :  { %s1658_s9 = sld [smem:[#allocation48_spill]]  ;;  %v1036_v60 = vmul.f32 %v225_v50, %v794_v0  ;;  %v1065_v50 = vmul.f32 %v270_v6, %v794_v0  ;;  %v1079_v6 = vmul.f32 %v300_v46, %v794_v0  ;;  %v118_v46 = vmul.f32 %v117_v23, %v1092_v52 }
  0xc1   :  { %1654 = sst [smem:[#allocation51_spill]] %s994_s26 }
  0xc2   :  { %s1660_s20 = sld [smem:[#allocation58_spill]]  ;;  %v199_v51 = vstv %s1655_s15 }
  0xc3   :  { %s1010_s11 = sld [smem:[#allocation6 + $0x52]] }
  0xc4   :  { %s1661_s27 = sld [smem:[#allocation50_spill]]  ;;  %v207_v53 = vstv %s1657_s5 }
  0xc5   :  { %s1662_s13 = sld [smem:[#allocation52_spill]]  ;;  %v330_v38 = vstv %s1002_s16 }
  0xc6   :  { %s1018_s7 = sld [smem:[#allocation7 + $0x12]]  ;;  %v214_v56 = vstv %s1658_s9 }
  0xc7   :  { %s1665_s26 = sld [smem:[#allocation54_spill]] }
  0xc8   :  { %s1024_s3 = sld [smem:[#allocation6 + $0x13]]  ;;  %v255_v58 = vstv %s1660_s20 }
  0xc9   :  { %s1668_s17 = sld [smem:[#allocation57_spill]]  ;;  %v1053_v18 = vmul.f32 %v255_v58, %v794_v0  ;;  %v1098_v58 = vmul.f32 %v330_v38, %v794_v0  ;;  %v77_v38 = vadd.f32 %v939_v9, %v73_v26  ;;  %v110_v9 = vmul.f32 %v109_v21, %v1128_v19 }
  0xca   :  { %s1032_s30 = sld [smem:[#allocation6 + $0x33]]  ;;  %v222_v59 = vstv %s1661_s27  ;;  %v125_v26 = vmul.f32 %v124_v25, %v1128_v19  ;;  %v122_v25 = vadd.f32 %v968_v24, %v118_v46 }
  0xcb   :  { %v229_v61 = vstv %s1662_s13  ;;  %s1040_s5 = sld [smem:[#allocation6 + $0x53]] }
  0xcc   :  { %1664 = sst [smem:[#allocation45_spill]] %s1018_s7  ;;  %v126_v46 = vadd.f32 %v125_v26, %v122_v25 }
  0xcd   :  { %v237_v63 = vstv %s1665_s26  ;;  %s1048_s20 = sld [smem:[#allocation7 + $0x13]] }
  0xce   :  { %s1673_s14 = sld [smem:[#allocation64_spill]] }
  0xcf   :  { %s1056_s24 = sld [smem:[#allocation6 + $0x14]] }
  0xd0   :  { %s1676_s28 = sld [smem:[#allocation37_spill]]  ;;  %v345_v30 = vstv %s1032_s30 }
  0xd1   :  { %1671 = sst [smem:[#allocation48_spill]] %s1040_s5  ;;  %v1118_v47 = vmul.f32 %v345_v30, %v794_v0  ;;  %v92_v30 = vadd.f32 %v951_v15, %v88_v2  ;;  %v107_v15 = vadd.f32 %v960_v20, %v103_v54  ;;  %v81_v2 = vadd.f32 %v80_v3, %v77_v38 }
  0xd2   :  { %s1062_s26 = sld [smem:[#allocation6 + $0x34]]  ;;  %v140_v20 = vmul.f32 %v139_v31, %v1128_v19  ;;  %v137_v31 = vadd.f32 %v977_v29, %v133_v5  ;;  %v167_v5 = vadd.f32 %v998_v40, %v163_v7 }
  0xd3   :  { %1672 = sst [smem:[#allocation58_spill]] %s1048_s20  ;;  %v96_v21 = vadd.f32 %v95_v4, %v92_v30  ;;  %v84_v10 = vadd.f32 %v83_v12, %v81_v2  ;;  %v111_v38 = vadd.f32 %v110_v9, %v107_v15  ;;  %v178_v9 = vmul.f32 %v177_v43, %v1092_v52 }
  0xd4   :  { %s1082_s10 = sld [smem:[#allocation6 + $0x54]]  ;;  %v141_v29 = vadd.f32 %v140_v20, %v137_v31  ;;  %v185_v43 = vmul.f32 %v184_v45, %v1128_v19  ;;  %v171_v26 = vadd.f32 %v170_v39, %v167_v5 }
  0xd5   :  { %1674 = sst [smem:[#allocation50_spill]] %s1056_s24  ;;  %v357_v13 = vstv %s1056_s24  ;;  %v85_v12 = vmax.f32 %v70_v62, %v84_v10  ;;  %v99_v24 = vadd.f32 %v98_v17, %v96_v21  ;;  %v114_v17 = vadd.f32 %v113_v22, %v111_v38 }
  0xd6   :  { %s1090_s16 = sld [smem:[#allocation7 + $0x14]]  ;;  %v129_v22 = vadd.f32 %v128_v27, %v126_v46  ;;  %v193_v21 = vmul.f32 %v192_v48, %v1092_v52  ;;  %v144_v40 = vadd.f32 %v143_v32, %v141_v29  ;;  %v182_v45 = vadd.f32 %v1006_v44, %v178_v9 }
  0xd7   :  { %s1100_s0 = sld [smem:[#allocation6 + $0x35]]  ;;  %v100_v4 = vmax.f32 %v85_v12, %v99_v24  ;;  %v200_v48 = vmul.f32 %v199_v51, %v1128_v19  ;;  %v208_v32 = vmul.f32 %v207_v53, %v1092_v52  ;;  %v223_v62 = vmul.f32 %v222_v59, %v1092_v52 }
  0xd8   :  { %s1120_s1 = sld [smem:[#allocation6 + $0x15]]  ;;  %v360_v14 = vstv %s1062_s26  ;;  %v186_v44 = vadd.f32 %v185_v43, %v182_v45  ;;  %v197_v51 = vadd.f32 %v1015_v49, %v193_v21  ;;  %v215_v53 = vmul.f32 %v214_v56, %v1128_v19 }
  0xd9   :  { %s1126_s2 = sld [smem:[#allocation6 + $0x55]]  ;;  %v1157_v23 = vmul.f32 %v360_v14, %v794_v0  ;;  %v115_v2 = vmax.f32 %v100_v4, %v114_v17  ;;  %v238_v59 = vmul.f32 %v237_v63, %v1092_v52  ;;  %v174_v56 = vadd.f32 %v173_v42, %v171_v26 }
  0xda   :  { %1683 = sst [smem:[#allocation52_spill]] %s1082_s10  ;;  %v364_v11 = vstv %s1082_s10  ;;  %v201_v7 = vadd.f32 %v200_v48, %v197_v51  ;;  %v212_v12 = vadd.f32 %v1027_v55, %v208_v32  ;;  %v1714_v63 = vstv %s1668_s17 }
  0xdb   :  { %s1136_s20 = sld [smem:[#allocation7 + $0x15]]  ;;  %v130_v27 = vmax.f32 %v115_v2, %v129_v22  ;;  %v253_v24 = vmul.f32 %v1714_v63, %v1092_v52  ;;  %v242_v9 = vadd.f32 %v1044_v1, %v238_v59 }
  0xdc   :  { %1685 = sst [smem:[#allocation57_spill]] %s1090_s16  ;;  %v368_v14 = vstv %s1090_s16  ;;  %v216_v42 = vadd.f32 %v215_v53, %v212_v12 }
  0xdd   :  { %s1150_s5 = sld [smem:[#allocation6 + $0x36]]  ;;  %v375_v54 = vstv %s1100_s0  ;;  %v145_v25 = vmax.f32 %v130_v27, %v144_v40  ;;  %v257_v1 = vadd.f32 %v1053_v18, %v253_v24  ;;  %v1728_v18 = vstv %s924_s23 }
  0xde   :  { %s1160_s29 = sld [smem:[#allocation6 + $0x16]]  ;;  %v372_v3 = vstv %s1120_s1  ;;  %v1195_v8 = vmul.f32 %v375_v54, %v794_v0  ;;  %v159_v54 = vadd.f32 %v158_v37, %v156_v35  ;;  %v230_v37 = vmul.f32 %v229_v61, %v1128_v19 }
  0xdf   :  { %1692 = sst [smem:[#allocation64_spill]] %s1126_s2  ;;  %v379_v30 = vstv %s1126_s2  ;;  %v227_v61 = vadd.f32 %v1036_v60, %v223_v62  ;;  %v290_v53 = vmul.f32 %v1728_v18, %v1128_v19 }
  0xe0   :  { %s1173_s21 = sld [smem:[#allocation6 + $0x37]]  ;;  %v160_v49 = vmax.f32 %v145_v25, %v159_v54 }
  0xe1   :  { %s1180_s19 = sld [smem:[#allocation6 + $0x56]]  ;;  %v383_v41 = vstv %s1136_s20  ;;  %v231_v60 = vadd.f32 %v230_v37, %v227_v61  ;;  %v1729_v37 = vstv %s1673_s14 }
  0xe2   :  { %s1190_s24 = sld [smem:[#allocation7 + $0x16]]  ;;  %v175_v36 = vmax.f32 %v160_v49, %v174_v56  ;;  %v298_v59 = vmul.f32 %v1729_v37, %v1092_v52 }
  0xe3   :  { %s1202_s6 = sld [smem:[#allocation6 + $0x17]]  ;;  %v390_v15 = vstv %s1150_s5 }
  0xe4   :  { %s1210_s4 = sld [smem:[#allocation6 + $0x57]]  ;;  %v387_v16 = vstv %s1160_s29  ;;  %v1230_v20 = vmul.f32 %v390_v15, %v794_v0 }
  0xe5   :  { %s1215_s2 = sld [smem:[#allocation6 + $0x38]] }
  0xe6   :  { %s1225_s5 = sld [smem:[#allocation7 + $0x17]]  ;;  %v405_v28 = vstv %s1173_s21 }
  0xe7   :  { %s1233_s7 = sld [smem:[#allocation6 + $0x18]]  ;;  %v394_v10 = vstv %s1180_s19  ;;  %v1265_v33 = vmul.f32 %v405_v28, %v794_v0  ;;  %v1724_v28 = vstv %s918_s18 }
  0xe8   :  { %v398_v38 = vstv %s1190_s24  ;;  %s1249_s21 = sld [smem:[#allocation6 + $0x58]]  ;;  %v283_v27 = vmul.f32 %v1724_v28, %v1092_v52 }
  0xe9   :  { %s1255_s15 = sld [smem:[#allocation7 + $0x18]]  ;;  %v402_v31 = vstv %s1202_s6 }
  0xea   :  { %s1711_s27 = sld [smem:[#allocation43_spill]]  ;;  %v409_v46 = vstv %s1210_s4 }
  0xeb   :  { %s1712_s16 = sld [smem:[#allocation55_spill]]  ;;  %v420_v29 = vstv %s1215_s2 }
  0xec   :  { %s1267_s0 = sld [smem:[#allocation6 + $0x39]]  ;;  %v413_v15 = vstv %s1225_s5  ;;  %v1305_v45 = vmul.f32 %v420_v29, %v794_v0  ;;  %v287_v29 = vadd.f32 %v1072_v57, %v283_v27 }
  0xed   :  { %s1713_s9 = sld [smem:[#allocation46_spill]]  ;;  %v417_v35 = vstv %s1233_s7 }
  0xee   :  { %s1715_s13 = sld [smem:[#allocation59_spill]]  ;;  %v424_v48 = vstv %s1249_s21 }
  0xef   :  { %s1716_s30 = sld [smem:[#allocation61_spill]]  ;;  %v428_v49 = vstv %s1255_s15 }
  0xf0   :  { %s1278_s22 = sld [smem:[#allocation6 + $0x19]]  ;;  %v1717_v39 = vstv %s1711_s27 }
  0xf1   :  { %v189_v4 = vadd.f32 %v1717_v39, %v186_v44  ;;  %v1718_v55 = vstv %s1712_s16  ;;  %s1719_s10 = sld [smem:[#allocation49_spill]]  ;;  %v1726_v44 = vstv %s914_s25 }
  0xf2   :  { %v245_v17 = vmul.f32 %v1718_v55, %v1128_v19  ;;  %s1288_s17 = sld [smem:[#allocation6 + $0x59]]  ;;  %v275_v51 = vmul.f32 %v1726_v44, %v1128_v19  ;;  %v435_v56 = vstv %s1267_s0  ;;  %v1747_v44 = vstv %s1024_s3 }
  0xf3   :  { %v190_v5 = vmax.f32 %v175_v36, %v189_v4  ;;  %v1720_v2 = vstv %s1713_s9  ;;  %s1723_s2 = sld [smem:[#allocation53_spill]]  ;;  %v1733_v36 = vstv %s948_s8  ;;  %v1735_v4 = vstv %s1676_s28 }
  0xf4   :  { %v204_v22 = vadd.f32 %v1720_v2, %v201_v7  ;;  %v1721_v43 = vstv %s1715_s13  ;;  %s1298_s26 = sld [smem:[#allocation7 + $0x19]]  ;;  %v246_v25 = vadd.f32 %v245_v17, %v242_v9  ;;  %v305_v39 = vmul.f32 %v1733_v36, %v1128_v19 }
  0xf5   :  { %v260_v21 = vmul.f32 %v1721_v43, %v1128_v19  ;;  %v1722_v40 = vstv %s1716_s30  ;;  %s1727_s12 = sld [smem:[#allocation56_spill]]  ;;  %v1337_v57 = vmul.f32 %v435_v56, %v794_v0  ;;  %v302_v2 = vadd.f32 %v1079_v6, %v298_v59 }
  0xf6   :  { %v268_v26 = vmul.f32 %v1722_v40, %v1092_v52  ;;  %v205_v32 = vmax.f32 %v190_v5, %v204_v22  ;;  %s1731_s18 = sld [smem:[#allocation41_spill]]  ;;  %v432_v55 = vstv %s1278_s22  ;;  %v358_v59 = vmul.f32 %v357_v13, %v1092_v52 }
  0xf7   :  { %v1725_v54 = vstv %s1719_s10  ;;  %s1732_s27 = sld [smem:[#allocation51_spill]]  ;;  %v261_v63 = vadd.f32 %v260_v21, %v257_v1  ;;  %v306_v6 = vadd.f32 %v305_v39, %v302_v2  ;;  %v365_v13 = vmul.f32 %v364_v11, %v1128_v19 }
  0xf8   :  { %v219_v62 = vadd.f32 %v1725_v54, %v216_v42  ;;  %v272_v24 = vadd.f32 %v1065_v50, %v268_v26  ;;  %s1734_s25 = sld [smem:[#allocation60_spill]]  ;;  %v313_v42 = vmul.f32 %v1735_v4, %v1092_v52  ;;  %v291_v50 = vadd.f32 %v290_v53, %v287_v29 }
  0xf9   :  { %v1730_v12 = vstv %s1723_s2  ;;  %s1332_s14 = sld [smem:[#allocation6 + $0x3a]]  ;;  %v439_v27 = vstv %s1288_s17  ;;  %v388_v36 = vmul.f32 %v387_v16, %v1092_v52  ;;  %v395_v16 = vmul.f32 %v394_v10, %v1128_v19 }
  0xfa   :  { %v220_v7 = vmax.f32 %v205_v32, %v219_v62  ;;  %v234_v61 = vadd.f32 %v1730_v12, %v231_v60  ;;  %v276_v5 = vadd.f32 %v275_v51, %v272_v24  ;;  %s1339_s23 = sld [smem:[#allocation6 + $0x1a]]  ;;  %v443_v32 = vstv %s1298_s26 }
  0xfb   :  { %v1736_v60 = vstv %s1727_s12  ;;  %s1737_s8 = sld [smem:[#allocation62_spill]]  ;;  %v317_v54 = vadd.f32 %v1087_v34, %v313_v42  ;;  %v1745_v62 = vstv %s1010_s11  ;;  %v343_v51 = vmul.f32 %v1747_v44, %v1092_v52 }
  0xfc   :  { %v235_v17 = vmax.f32 %v220_v7, %v234_v61  ;;  %v249_v9 = vadd.f32 %v1736_v60, %v246_v25  ;;  %v1738_v22 = vstv %s1731_s18  ;;  %s1348_s16 = sld [smem:[#allocation6 + $0x5a]]  ;;  %v335_v25 = vmul.f32 %v1745_v62, %v1128_v19 }
  0xfd   :  { %v320_v43 = vmul.f32 %v1738_v22, %v1128_v19  ;;  %v1740_v21 = vstv %s1732_s27  ;;  %s1741_s0 = sld [smem:[#allocation63_spill]]  ;;  %v373_v34 = vmul.f32 %v372_v3, %v1092_v52  ;;  %v380_v3 = vmul.f32 %v379_v30, %v1128_v19 }
  0xfe   :  { %v328_v40 = vmul.f32 %v1740_v21, %v1092_v52  ;;  %v250_v26 = vmax.f32 %v235_v17, %v249_v9  ;;  %v1742_v1 = vstv %s1734_s25  ;;  %s1743_s9 = sld [smem:[#allocation48_spill]]  ;;  %v347_v42 = vadd.f32 %v1118_v47, %v343_v51 }
  0xff   :  { %v264_v28 = vadd.f32 %v1742_v1, %v261_v63  ;;  %s1354_s13 = sld [smem:[#allocation7 + $0x1a]]  ;;  %v321_v12 = vadd.f32 %v320_v43, %v317_v54  ;;  %v450_v17 = vstv %s1332_s14  ;;  %v362_v60 = vadd.f32 %v1157_v23, %v358_v59 }
 0x100   :  { %s1363_s2 = sld [smem:[#allocation6 + $0x1b]]  ;;  %v332_v61 = vadd.f32 %v1098_v58, %v328_v40  ;;  %v377_v30 = vadd.f32 %v1195_v8, %v373_v34  ;;  %v447_v2 = vstv %s1339_s23  ;;  %v392_v10 = vadd.f32 %v1230_v20, %v388_v36 }
 0x101   :  { %s1748_s12 = sld [smem:[#allocation33_spill]]  ;;  %v265_v18 = vmax.f32 %v250_v26, %v264_v28  ;;  %v1749_v53 = vstv %s1737_s8  ;;  %v366_v8 = vadd.f32 %v365_v13, %v362_v60  ;;  %v410_v43 = vmul.f32 %v409_v46, %v1128_v19 }
 0x102   :  { %v279_v37 = vadd.f32 %v1749_v53, %v276_v5  ;;  %s1373_s11 = sld [smem:[#allocation6 + $0x3b]]  ;;  %v336_v4 = vadd.f32 %v335_v25, %v332_v61  ;;  %v381_v22 = vadd.f32 %v380_v3, %v377_v30  ;;  %v451_v21 = vmul.f32 %v450_v17, %v794_v0 }
 0x103   :  { %v1750_v56 = vstv %s1741_s0  ;;  %s1381_s3 = sld [smem:[#allocation6 + $0x5b]]  ;;  %v454_v40 = vstv %s1348_s16  ;;  %v396_v20 = vadd.f32 %v395_v16, %v392_v10  ;;  %v440_v34 = vmul.f32 %v439_v27, %v1128_v19  ;;  %s764_s16 = smov [#allocation9]  }
 0x104   :  { %v294_v7 = vadd.f32 %v1750_v56, %v291_v50  ;;  %v1751_v63 = vstv %s1743_s9  ;;  %s1752_s18 = sld [smem:[#allocation42_spill]]  ;;  %v280_v29 = vmax.f32 %v265_v18, %v279_v37  ;;  %v403_v50 = vmul.f32 %v402_v31, %v1092_v52  ;;  %s544_s0 = sshll.u32 %s764_s16, 4  ;;  %s545_s0 = int_to_ptr.vmem [resolvable:$true] %s544_s0 }
 0x105   :  { %v350_v24 = vmul.f32 %v1751_v63, %v1128_v19  ;;  %s1392_s1 = sld [smem:[#allocation7 + $0x1b]]  ;;  %v418_v31 = vmul.f32 %v417_v35, %v1092_v52  ;;  %v425_v35 = vmul.f32 %v424_v48, %v1128_v19  ;;  %v458_v54 = vstv %s1354_s13  ;;  %s731_s9 = scalar_lea.vmem %s545_s0, 128 }
 0x106   :  { %s1398_s27 = sld [smem:[#allocation6 + $0x1c]]  ;;  %v295_v11 = vmax.f32 %v280_v29, %v294_v7  ;;  %v407_v46 = vadd.f32 %v1265_v33, %v403_v50  ;;  %v462_v62 = vstv %s1363_s2  ;;  %v369_v18 = vadd.f32 %v368_v14, %v366_v8  ;;  %p732_p1 = scmp.ne.s32.totalorder %s545_s0, %s731_s9 }
 0x107   :  { %v1753_v58 = vstv %s1748_s12  ;;  %s1405_s29 = sld [smem:[#allocation6 + $0x3c]]  ;;  %v351_v47 = vadd.f32 %v350_v24, %v347_v42  ;;  %v422_v53 = vadd.f32 %v1305_v45, %v418_v31  ;;  %v448_v48 = vmul.f32 %v447_v2, %v1092_v52  ;;  %p736_p2 = scmp.lt.s32.totalorder %s545_s0, %s545_s0 }
 0x108   :  { %v309_v39 = vadd.f32 %v1753_v58, %v306_v6  ;;  %s1755_s25 = sld [smem:[#allocation45_spill]]  ;;  %v433_v6 = vmul.f32 %v432_v55, %v1092_v52  ;;  %v384_v55 = vadd.f32 %v383_v41, %v381_v22  ;;  %v411_v33 = vadd.f32 %v410_v43, %v407_v46  ;;  %p737_p3 = scmp.lt.s32.totalorder %s731_s9, %s731_s9 }
 0x109   :  { %s1413_s14 = sld [smem:[#allocation6 + $0x5c]]  ;;  %v465_v37 = vstv %s1373_s11  ;;  %v399_v14 = vadd.f32 %v398_v38, %v396_v20  ;;  %v426_v45 = vadd.f32 %v425_v35, %v422_v53  ;;  %v455_v56 = vmul.f32 %v454_v40, %v1128_v19 }
 0x10a   :  { %v1754_v9 = vstv %s1752_s18  ;;  %v310_v23 = vmax.f32 %v295_v11, %v309_v39  ;;  %s1416_s19 = sld [smem:[#allocation6 + $0x1d]]  ;;  %v437_v41 = vadd.f32 %v1337_v57, %v433_v6  ;;  %v463_v7 = vmul.f32 %v462_v62, %v1092_v52  ;;  %p738_p4 = por %p737_p3, %p736_p2 }
 0x10b   :  { %v324_v5 = vadd.f32 %v1754_v9, %v321_v12  ;;  %s1756_s6 = sld [smem:[#allocation58_spill]]  ;;  %v469_v12 = vstv %s1381_s3  ;;  %v466_v38 = vmul.f32 %v465_v37, %v794_v0  ;;  %v414_v24 = vadd.f32 %v413_v15, %v411_v33 }
 0x10c   :  { %s1426_s8 = sld [smem:[#allocation6 + $0x3d]]  ;;  %v477_v63 = vstv %s1398_s27  ;;  %v452_v27 = vadd.f32 %v451_v21, %v448_v48  ;;  %v441_v36 = vadd.f32 %v440_v34, %v437_v41  ;;  %v470_v58 = vmul.f32 %v469_v12, %v1128_v19  ;;  %p739_p5 = pnand %p738_p4, %p732_p1 }
 0x10d   :  { %v325_v26 = vmax.f32 %v310_v23, %v324_v5  ;;  %s1433_s4 = sld [smem:[#allocation6 + $0x5d]]  ;;  %v480_v57 = vstv %s1405_s29  ;;  %v478_v15 = vmul.f32 %v477_v63, %v1092_v52  ;;  %v467_v60 = vadd.f32 %v466_v38, %v463_v7 }
 0x10e   :  { %v1758_v1 = vstv %s1755_s25  ;;  %s1441_s7 = sld [smem:[#allocation6 + $0x1e]]  ;;  %v456_v42 = vadd.f32 %v455_v56, %v452_v27  ;;  %v481_v17 = vmul.f32 %v480_v57, %v794_v0  ;;  %v444_v2 = vadd.f32 %v443_v32, %v441_v36 }
 0x10f   :  { %v339_v28 = vadd.f32 %v1758_v1, %v336_v4  ;;  %s1449_s22 = sld [smem:[#allocation6 + $0x3e]]  ;;  %v484_v29 = vstv %s1413_s14  ;;  %v429_v4 = vadd.f32 %v428_v49, %v426_v45  ;;  %v471_v23 = vadd.f32 %v470_v58, %v467_v60 }
 0x110   :  { %s1454_s21 = sld [smem:[#allocation6 + $0x5e]]  ;;  %v492_v13 = vstv %s1416_s19  ;;  %v485_v30 = vmul.f32 %v484_v29, %v1128_v19  ;;  %v473_v8 = vstv %s1392_s1  ;;  %v482_v22 = vadd.f32 %v481_v17, %v478_v15 }
 0x111   :  { %v340_v25 = vmax.f32 %v325_v26, %v339_v28  ;;  %v1759_v44 = vstv %s1756_s6  ;;  %s1462_s20 = sld [smem:[#allocation6 + $0x1f]]  ;;  %v493_v16 = vmul.f32 %v492_v13, %v1092_v52  ;;  %v459_v28 = vadd.f32 %v458_v54, %v456_v42 }
 0x112   :  { %v354_v51 = vadd.f32 %v1759_v44, %v351_v47  ;;  %s1467_s28 = sld [smem:[#allocation6 + $0x3f]]  ;;  %v495_v39 = vstv %s1426_s8  ;;  %v486_v32 = vadd.f32 %v485_v30, %v482_v22  ;;  %v474_v44 = vadd.f32 %v473_v8, %v471_v23 }
 0x113   :  { %s1476_s24 = sld [smem:[#allocation6 + $0x5f]]  ;;  %v496_v9 = vmul.f32 %v495_v39, %v794_v0  ;;  %v499_v49 = vstv %s1433_s4 }
 0x114   :  { %v355_v59 = vmax.f32 %v340_v25, %v354_v51  ;;  %s1484_s5 = sld [smem:[#allocation7 + $0x1c]]  ;;  %v507_v5 = vstv %s1441_s7  ;;  %v500_v40 = vmul.f32 %v499_v49, %v1128_v19 }
 0x115   :  { %s1490_s15 = sld [smem:[#allocation7 + $0x1d]]  ;;  %v510_v47 = vstv %s1449_s22  ;;  %v508_v26 = vmul.f32 %v507_v5, %v1092_v52  ;;  %v497_v20 = vadd.f32 %v496_v9, %v493_v16 }
 0x116   :  { %v370_v61 = vmax.f32 %v355_v59, %v369_v18  ;;  %v514_v10 = vstv %s1454_s21  ;;  %s1498_s17 = sld [smem:[#allocation7 + $0x1e]]  ;;  %v511_v1 = vmul.f32 %v510_v47, %v794_v0 }
 0x117   :  { %v522_v43 = vstv %s1462_s20  ;;  %s680_s26 = sld [smem:[#allocation7 + $0x1f]]  ;;  %v515_v35 = vmul.f32 %v514_v10, %v1128_v19 }
 0x118   :  { %v385_v3 = vmax.f32 %v370_v61, %v384_v55  ;;  %v525_v31 = vstv %s1467_s28  ;;  %v523_v62 = vmul.f32 %v522_v43, %v1092_v52  ;;  %v501_v55 = vadd.f32 %v500_v40, %v497_v20 }
 0x119   :  { %v529_v6 = vstv %s1476_s24  ;;  %v526_v25 = vmul.f32 %v525_v31, %v794_v0  ;;  %v512_v33 = vadd.f32 %v511_v1, %v508_v26 }
 0x11a   :  { %v400_v11 = vmax.f32 %v385_v3, %v399_v14  ;;  %v488_v51 = vstv %s1484_s5  ;;  %v530_v53 = vmul.f32 %v529_v6, %v1128_v19 }
 0x11b   :  { %v503_v54 = vstv %s1490_s15  ;;  %v489_v37 = vadd.f32 %v488_v51, %v486_v32  ;;  %v516_v59 = vadd.f32 %v515_v35, %v512_v33  ;;  %v527_v14 = vadd.f32 %v526_v25, %v523_v62 }
 0x11c   :  { %v415_v50 = vmax.f32 %v400_v11, %v414_v24  ;;  %v518_v41 = vstv %s1498_s17  ;;  %v504_v45 = vadd.f32 %v503_v54, %v501_v55 }
 0x11d   :  { %v531_v56 = vadd.f32 %v530_v53, %v527_v14  ;;  %v533_v7 = vstv %s680_s26  ;;  %v519_v12 = vadd.f32 %v518_v41, %v516_v59 }
 0x11e   :  { %v430_v21 = vmax.f32 %v415_v50, %v429_v4 }
 0x11f   :  { %v534_v61 = vadd.f32 %v533_v7, %v531_v56 }
 0x120   :  { %v445_v46 = vmax.f32 %v430_v21, %v444_v2 }
 0x122   :  { %v460_v18 = vmax.f32 %v445_v46, %v459_v28 }
 0x124   :  { %v475_v48 = vmax.f32 %v460_v18, %v474_v44 }
 0x126   :  { %v490_v34 = vmax.f32 %v475_v48, %v489_v37 }
 0x128   :  { %v505_v52 = vmax.f32 %v490_v34, %v504_v45 }
 0x12a   :  { %v520_v0 = vmax.f32 %v505_v52, %v519_v12 }
 0x12c   :  { %v535_v38 = vmax.f32 %v520_v0, %v534_v61 }
 0x12e   :  { %v536_v63 = vmax.f32 %v535_v38, 0.0 }
 0x130   :  { %537 = vst [vmem:[#allocation9] sm:$0xff] %v536_v63 }
 0x131   :  { %742 = shalt.err (!%p739_p5)
}
 0x132   :  { %s1760_s10 = sld [smem:[#allocation65_spill]] }
 0x138   :  { %547 = dma.vmem_to_hbm [thread:$0]  %s545_s0, 128, %s1760_s10, [#allocation4]  }
 0x139   :  { %757 = dma.done.wait [#allocation4], 128  }
 0x13a   :  { %758 = vsyncadd [#allocation4], 4294967168 }
 0x13b   :  { %551 = vsyncpa [#allocation3], 1 }
 0x13c   :  { %552 = vsyncpa [#allocation4], 1 }
 0x13d   :  { %553 = vsyncpa [#allocation5], 1 }
 0x13e   :  { %554 = vsyncpa [#allocation8], 1 }

</bundles_post_ra>
